<compile_context>
chip_gen: v6e
topology: v6e:2x2x1
jax: 0.10.0
libtpu: 0.0.40
codegen_flags: <defaults>
</compile_context>

<pallas_src>
import functools

import jax
import jax.numpy as jnp
from jax import lax
from jax.experimental import pallas as pl
from jax.experimental.pallas import tpu as pltpu


# ----------------------------- Pallas kernel --------------------------------


def bilstm_mean_kernel(xf_ref, xr_ref, wif_ref, wir_ref, whh_ref, bf_ref, br_ref,
                       out_ref, h_ref, c_ref, acc_ref, *,
                       hidden_size, batch_pad, chunk_len, seq_len):
    """One grid step = one time chunk of the fused fwd+rev recurrence.

    xf_ref : (tT*Bp, F)  time-major forward chunk i   (row t*Bp+b = x[b, i*tT+t])
    xr_ref : (tT*Bp, F)  time-major chunk N-1-i       (reverse-direction input)
    wif/wir: (F, 4H)     per-direction input weights, gate columns [i | f | o | g]
    whh    : (2H, 8H)    block-diag recurrent weights, columns [fwd 4H | rev 4H]
    bf/br  : (1, 4H)     combined b_ih+b_hh per direction, gate order [i | f | o | g]
    out_ref: (Bp, 2H)    mean over time of [h_fwd | h_rev]
    h/c/acc: (Bp, 2H)    VMEM scratch carried across grid steps (f32)
    """
    H = hidden_size
    B = batch_pad
    tT = chunk_len
    ci = pl.program_id(0)

    @pl.when(ci == 0)
    def _init():
        h_ref[...] = jnp.zeros_like(h_ref)
        c_ref[...] = jnp.zeros_like(c_ref)
        acc_ref[...] = jnp.zeros_like(acc_ref)

    # Hoisted per-chunk input projections (bias folded); operands may be bf16,
    # accumulation is f32.  One (tT*Bp, F) @ (F, 4H) matmul per direction.
    gproj_f = (jnp.dot(xf_ref[...], wif_ref[...],
                       preferred_element_type=jnp.float32) + bf_ref[...])
    gproj_r = (jnp.dot(xr_ref[...], wir_ref[...],
                       preferred_element_type=jnp.float32) + br_ref[...])

    w_hh = whh_ref[...]                    # (2H, 8H), resident across the chunk
    mm_dtype = w_hh.dtype

    h = h_ref[...]                         # (Bp, 2H) f32, [h_f | h_r]
    c = c_ref[...]
    acc = acc_ref[...]
    c_f = c[:, :H]
    c_r = c[:, H:]

    # Fused forward+reverse recurrence, statically unrolled over the chunk.
    # The reverse direction reads its chunk back-to-front, so grid step i /
    # local step t corresponds to original time T-1-(i*tT+t).
    for t in range(tT):
        rec = jnp.dot(h.astype(mm_dtype), w_hh,
                      preferred_element_type=jnp.float32)            # (Bp, 8H)
        gf = gproj_f[t * B:(t + 1) * B, :] + rec[:, :4 * H]
        gr = gproj_r[(tT - 1 - t) * B:(tT - t) * B, :] + rec[:, 4 * H:]
        sf = jax.nn.sigmoid(gf[:, :3 * H])          # [i_f | f_f | o_f]
        sr = jax.nn.sigmoid(gr[:, :3 * H])          # [i_r | f_r | o_r]
        gg_f = jnp.tanh(gf[:, 3 * H:])
        gg_r = jnp.tanh(gr[:, 3 * H:])
        c_f = sf[:, H:2 * H] * c_f + sf[:, :H] * gg_f
        c_r = sr[:, H:2 * H] * c_r + sr[:, :H] * gg_r
        h_f = sf[:, 2 * H:] * jnp.tanh(c_f)
        h_r = sr[:, 2 * H:] * jnp.tanh(c_r)
        h = jnp.concatenate([h_f, h_r], axis=1)                       # (Bp, 2H)
        acc = acc + h

    h_ref[...] = h
    c_ref[...] = jnp.concatenate([c_f, c_r], axis=1)
    acc_ref[...] = acc

    @pl.when(ci == pl.num_programs(0) - 1)
    def _finalize():
        # Single lane-dense (Bp, 2H) store.
        out_ref[...] = (acc * (1.0 / seq_len)).astype(out_ref.dtype)


# ------------------------------- wrapper -------------------------------------


def _vmem_chunk_budget_bytes():
    """Conservative per-chunk VMEM budget (fraction of physical VMEM)."""
    try:
        cap = int(getattr(pltpu.get_tpu_info(), "vmem_capacity_bytes", 64 << 20))
    except Exception:  # query unavailable (e.g. interpret mode) -> conservative
        cap = 64 << 20
    return max(cap // 4, 8 << 20)


def _pick_chunk(T, B_pad, F, H, x_itemsize):
    """Largest divisor of T whose per-chunk live set fits the VMEM budget."""
    budget = _vmem_chunk_budget_bytes()
    # per-timestep live bytes: 2 x-chunk streams (double-buffered) + f32 gate projections.
    per_t = B_pad * (2 * 2 * F * x_itemsize + 8 * H * 4)
    t_max = max(1, min(256, budget // max(per_t, 1)))
    tT = 1
    for d in range(1, T + 1):
        if T % d == 0 and d <= t_max:
            tT = d
    return tT


@functools.partial(jax.jit, static_argnames=("hidden_size", "use_bf16"))
def encoder_forward(x, packed, hidden_size, use_bf16=True):
    """x: (B, T, F) float32 -> (B, 2*hidden_size) float32."""
    B, T, F = x.shape
    H = hidden_size
    mm_dtype = jnp.bfloat16 if use_bf16 else jnp.float32

    # Pad batch to a sublane multiple so per-timestep row slabs are aligned.
    B_pad = ((B + 7) // 8) * 8
    x_p = x if B_pad == B else jnp.pad(x, ((0, B_pad - B), (0, 0), (0, 0)))
    # Time-major rows: row t*B_pad + b holds x[b, t, :].
    x_tm = jnp.transpose(x_p, (1, 0, 2)).reshape(T * B_pad, F).astype(mm_dtype)

    w_if = packed["w_if"].astype(mm_dtype)
    w_ir = packed["w_ir"].astype(mm_dtype)
    w_hh = packed["w_hh"].astype(mm_dtype)
    b_f = packed["b_f"].astype(jnp.float32)
    b_r = packed["b_r"].astype(jnp.float32)

    tT = _pick_chunk(T, B_pad, F, H, jnp.dtype(mm_dtype).itemsize)
    num_chunks = T // tT

    kernel = functools.partial(
        bilstm_mean_kernel, hidden_size=H, batch_pad=B_pad, chunk_len=tT,
        seq_len=T)

    cost = pl.CostEstimate(
        flops=2 * T * B_pad * (F * 8 * H + 2 * H * 8 * H),
        transcendentals=10 * T * B_pad * H,
        bytes_accessed=(2 * x_tm.size * x_tm.dtype.itemsize
                        + (w_if.size + w_ir.size + w_hh.size) * w_hh.dtype.itemsize
                        + B_pad * 2 * H * 4))

    out = pl.pallas_call(
        kernel,
        out_shape=jax.ShapeDtypeStruct((B_pad, 2 * H), jnp.float32),
        grid=(num_chunks,),
        in_specs=[
            pl.BlockSpec((tT * B_pad, F), lambda i: (i, 0)),                 # fwd x chunk
            pl.BlockSpec((tT * B_pad, F),
                         lambda i: (num_chunks - 1 - i, 0)),                 # rev x chunk
            pl.BlockSpec((F, 4 * H), lambda i: (0, 0)),                      # w_if (resident)
            pl.BlockSpec((F, 4 * H), lambda i: (0, 0)),                      # w_ir
            pl.BlockSpec((2 * H, 8 * H), lambda i: (0, 0)),                  # w_hh
            pl.BlockSpec((1, 4 * H), lambda i: (0, 0)),                      # b_f
            pl.BlockSpec((1, 4 * H), lambda i: (0, 0)),                      # b_r
        ],
        out_specs=pl.BlockSpec((B_pad, 2 * H), lambda i: (0, 0)),
        scratch_shapes=[
            pltpu.VMEM((B_pad, 2 * H), jnp.float32),   # h = [h_f | h_r]
            pltpu.VMEM((B_pad, 2 * H), jnp.float32),   # c = [c_f | c_r]
            pltpu.VMEM((B_pad, 2 * H), jnp.float32),   # running sum of h over time
        ],
        compiler_params=pltpu.CompilerParams(
            dimension_semantics=("arbitrary",),
            vmem_limit_bytes=64 * 1024 * 1024),
        cost_estimate=cost,
    )(x_tm, x_tm, w_if, w_ir, w_hh, b_f, b_r)

    return out[:B]


# ------------------------- params: init / packing ----------------------------


def init_params(key, no_features, hidden_size):
    """PyTorch-LSTM-style init U(-1/sqrt(H), 1/sqrt(H)); weights pre-transposed
    to (F, 4H)/(H, 4H) with PyTorch gate order [i, f, g, o] in the columns."""
    k = 1.0 / jnp.sqrt(jnp.float32(hidden_size))
    keys = jax.random.split(key, 8)

    def u(kk, shape):
        return jax.random.uniform(kk, shape, jnp.float32, -k, k)

    return {
        "wih_f": u(keys[0], (no_features, 4 * hidden_size)),
        "whh_f": u(keys[1], (hidden_size, 4 * hidden_size)),
        "b_f": u(keys[2], (1, 4 * hidden_size)) + u(keys[3], (1, 4 * hidden_size)),
        "wih_r": u(keys[4], (no_features, 4 * hidden_size)),
        "whh_r": u(keys[5], (hidden_size, 4 * hidden_size)),
        "b_r": u(keys[6], (1, 4 * hidden_size)) + u(keys[7], (1, 4 * hidden_size)),
    }


def _perm_ifog(w, H):
    """Gate columns [i, f, g, o] -> [i, f, o, g] (sigmoid gates contiguous)."""
    i, f, g, o = (w[:, k * H:(k + 1) * H] for k in range(4))
    return jnp.concatenate([i, f, o, g], axis=1)


def pack_params(params, hidden_size):
    """One-time layout transform for the kernel (kept f32; wrapper casts)."""
    H = hidden_size
    zH = jnp.zeros((H, 4 * H), jnp.float32)
    whh_f = _perm_ifog(params["whh_f"], H)
    whh_r = _perm_ifog(params["whh_r"], H)
    w_hh = jnp.concatenate(
        [jnp.concatenate([whh_f, zH], axis=1),
         jnp.concatenate([zH, whh_r], axis=1)], axis=0)           # (2H, 8H)
    return {
        "w_if": _perm_ifog(params["wih_f"], H),                   # (F, 4H)
        "w_ir": _perm_ifog(params["wih_r"], H),                   # (F, 4H)
        "w_hh": w_hh,                                             # (2H, 8H)
        "b_f": _perm_ifog(params["b_f"], H),                      # (1, 4H)
        "b_r": _perm_ifog(params["b_r"], H),                      # (1, 4H)
    }


# ------------------------------ reference ------------------------------------


def reference_forward(x, params, H):
    """Pure-JAX reference of the PyTorch Encoder.forward (unpacked weights)."""
    B, T, F = x.shape
    zeros = jnp.zeros((B, H), jnp.float32)

    def make_step(wih, whh, b):
        def step(carry, x_t):
            h, c = carry
            gates = x_t @ wih + h @ whh + b
            i = jax.nn.sigmoid(gates[:, :H])
            f = jax.nn.sigmoid(gates[:, H:2 * H])
            g = jnp.tanh(gates[:, 2 * H:3 * H])
            o = jax.nn.sigmoid(gates[:, 3 * H:])
            c = f * c + i * g
            h = o * jnp.tanh(c)
            return (h, c), h
        return step

    x_tm = jnp.transpose(x, (1, 0, 2))
    _, hs_f = lax.scan(make_step(params["wih_f"], params["whh_f"], params["b_f"]),
                       (zeros, zeros), x_tm)
    _, hs_r = lax.scan(make_step(params["wih_r"], params["whh_r"], params["b_r"]),
                       (zeros, zeros), x_tm[::-1])
    return jnp.concatenate([hs_f.mean(0), hs_r.mean(0)], axis=-1)


if __name__ == "__main__":
    batch, seq_len, no_features, embedding_size = 2, 8, 4, 32

    key = jax.random.PRNGKey(0)
    k_x, k_p = jax.random.split(key)
    x = jax.random.normal(k_x, (batch, seq_len, no_features), jnp.float32)
    params = init_params(k_p, no_features, embedding_size)
    packed = pack_params(params, embedding_size)

    ref = jax.block_until_ready(reference_forward(x, params, embedding_size))

    # f32 matmul path: bit-tight check vs the f32 reference.
    out_f32 = jax.block_until_ready(
        encoder_forward(x, packed, embedding_size, use_bf16=False))
    assert out_f32.shape == (batch, 2 * embedding_size)
    assert jnp.allclose(out_f32, ref, atol=1e-4, rtol=1e-4), "f32 kernel mismatch"

    # bf16-matmul / f32-accumulate path (the fast default).
    out_bf16 = jax.block_until_ready(
        encoder_forward(x, packed, embedding_size, use_bf16=True))
    assert out_bf16.shape == (batch, 2 * embedding_size)
    assert jnp.allclose(out_bf16, ref, atol=3e-2, rtol=3e-2), "bf16 kernel mismatch"

    print("KERNEL_OK")
</pallas_src>

<mosaic_0001>
module attributes {stable_mosaic.version = 11 : i64} {
  func.func @bilstm_mean_kernel(%arg0: i32, %arg1: memref<64x4xf32, #tpu.memory_space<vmem>>, %arg2: memref<64x4xf32, #tpu.memory_space<vmem>>, %arg3: memref<4x128xf32, #tpu.memory_space<vmem>>, %arg4: memref<4x128xf32, #tpu.memory_space<vmem>>, %arg5: memref<64x256xf32, #tpu.memory_space<vmem>>, %arg6: memref<1x128xf32, #tpu.memory_space<vmem>>, %arg7: memref<1x128xf32, #tpu.memory_space<vmem>>, %arg8: memref<8x64xf32, #tpu.memory_space<vmem>>, %arg9: memref<8x64xf32, #tpu.memory_space<vmem>>, %arg10: memref<8x64xf32, #tpu.memory_space<vmem>>, %arg11: memref<8x64xf32, #tpu.memory_space<vmem>>) attributes {dimension_semantics = [#tpu.dimension_semantics<arbitrary>], iteration_bounds = array<i64: 1>, scalar_prefetch = 0 : i64, scratch_operands = 3 : i64, tpu.core_type = #tpu.core_type<tc>, window_params = [{transform_indices = @transform_0, window_bounds = array<i64: 64, 4>}, {transform_indices = @transform_1, window_bounds = array<i64: 64, 4>}, {pipeline_mode = #tpu.pipeline_mode<synchronous>, transform_indices = @transform_2, window_bounds = array<i64: 4, 128>}, {pipeline_mode = #tpu.pipeline_mode<synchronous>, transform_indices = @transform_3, window_bounds = array<i64: 4, 128>}, {pipeline_mode = #tpu.pipeline_mode<synchronous>, transform_indices = @transform_4, window_bounds = array<i64: 64, 256>}, {pipeline_mode = #tpu.pipeline_mode<synchronous>, transform_indices = @transform_5, window_bounds = array<i64: 1, 128>}, {pipeline_mode = #tpu.pipeline_mode<synchronous>, transform_indices = @transform_6, window_bounds = array<i64: 1, 128>}, {pipeline_mode = #tpu.pipeline_mode<synchronous>, transform_indices = @transform_7, window_bounds = array<i64: 8, 64>}]} {
    %c0_i32 = arith.constant 0 : i32
    %0 = arith.cmpi eq, %arg0, %c0_i32 : i32
    %1 = arith.extui %0 : i1 to i32
    %c0_i32_0 = arith.constant 0 : i32
    %2 = arith.cmpi ne, %1, %c0_i32_0 : i32
    scf.if %2 {
      %cst_53 = arith.constant 0.000000e+00 : f32
      %356 = vector.broadcast %cst_53 : f32 to vector<8x64xf32>
      %c0_54 = arith.constant 0 : index
      %c0_55 = arith.constant 0 : index
      %357 = vector.load %arg9[%c0_54, %c0_55] : memref<8x64xf32, #tpu.memory_space<vmem>>, vector<8x64xf32>
      tpu.vector_store %arg9[%c0_54, %c0_55], %356 {strides = array<i32>} : memref<8x64xf32, #tpu.memory_space<vmem>>, vector<8x64xf32>,
      %cst_56 = arith.constant 0.000000e+00 : f32
      %358 = vector.broadcast %cst_56 : f32 to vector<8x64xf32>
      %c0_57 = arith.constant 0 : index
      %c0_58 = arith.constant 0 : index
      %359 = vector.load %arg10[%c0_57, %c0_58] : memref<8x64xf32, #tpu.memory_space<vmem>>, vector<8x64xf32>
      tpu.vector_store %arg10[%c0_57, %c0_58], %358 {strides = array<i32>} : memref<8x64xf32, #tpu.memory_space<vmem>>, vector<8x64xf32>,
      %cst_59 = arith.constant 0.000000e+00 : f32
      %360 = vector.broadcast %cst_59 : f32 to vector<8x64xf32>
      %c0_60 = arith.constant 0 : index
      %c0_61 = arith.constant 0 : index
      %361 = vector.load %arg11[%c0_60, %c0_61] : memref<8x64xf32, #tpu.memory_space<vmem>>, vector<8x64xf32>
      tpu.vector_store %arg11[%c0_60, %c0_61], %360 {strides = array<i32>} : memref<8x64xf32, #tpu.memory_space<vmem>>, vector<8x64xf32>,
    } else {
    }
    %c0 = arith.constant 0 : index
    %c0_1 = arith.constant 0 : index
    %3 = vector.load %arg1[%c0, %c0_1] : memref<64x4xf32, #tpu.memory_space<vmem>>, vector<64x4xf32>
    %c0_2 = arith.constant 0 : index
    %c0_3 = arith.constant 0 : index
    %4 = vector.load %arg3[%c0_2, %c0_3] : memref<4x128xf32, #tpu.memory_space<vmem>>, vector<4x128xf32>
    %cst = arith.constant dense<0.000000e+00> : vector<64x128xf32>
    %5 = tpu.matmul %3, %4, %cst {dimension_numbers = #tpu.dot_dimension_numbers<[1], [0], [0], [1], [0, 0, 1, 1], [], []>} : vector<64x4xf32>, vector<4x128xf32>, vector<64x128xf32> -> vector<64x128xf32>
    %c0_4 = arith.constant 0 : index
    %c0_5 = arith.constant 0 : index
    %6 = vector.load %arg6[%c0_4, %c0_5] : memref<1x128xf32, #tpu.memory_space<vmem>>, vector<1x128xf32>
    %7 = vector.broadcast %6 : vector<1x128xf32> to vector<64x128xf32>
    %8 = arith.addf %5, %7 : vector<64x128xf32>
    %c0_6 = arith.constant 0 : index
    %c0_7 = arith.constant 0 : index
    %9 = vector.load %arg2[%c0_6, %c0_7] : memref<64x4xf32, #tpu.memory_space<vmem>>, vector<64x4xf32>
    %c0_8 = arith.constant 0 : index
    %c0_9 = arith.constant 0 : index
    %10 = vector.load %arg4[%c0_8, %c0_9] : memref<4x128xf32, #tpu.memory_space<vmem>>, vector<4x128xf32>
    %cst_10 = arith.constant dense<0.000000e+00> : vector<64x128xf32>
    %11 = tpu.matmul %9, %10, %cst_10 {dimension_numbers = #tpu.dot_dimension_numbers<[1], [0], [0], [1], [0, 0, 1, 1], [], []>} : vector<64x4xf32>, vector<4x128xf32>, vector<64x128xf32> -> vector<64x128xf32>
    %c0_11 = arith.constant 0 : index
    %c0_12 = arith.constant 0 : index
    %12 = vector.load %arg7[%c0_11, %c0_12] : memref<1x128xf32, #tpu.memory_space<vmem>>, vector<1x128xf32>
    %13 = vector.broadcast %12 : vector<1x128xf32> to vector<64x128xf32>
    %14 = arith.addf %11, %13 : vector<64x128xf32>
    %c0_13 = arith.constant 0 : index
    %c0_14 = arith.constant 0 : index
    %15 = vector.load %arg5[%c0_13, %c0_14] : memref<64x256xf32, #tpu.memory_space<vmem>>, vector<64x256xf32>
    %c0_15 = arith.constant 0 : index
    %c0_16 = arith.constant 0 : index
    %16 = vector.load %arg9[%c0_15, %c0_16] : memref<8x64xf32, #tpu.memory_space<vmem>>, vector<8x64xf32>
    %c0_17 = arith.constant 0 : index
    %c0_18 = arith.constant 0 : index
    %17 = vector.load %arg10[%c0_17, %c0_18] : memref<8x64xf32, #tpu.memory_space<vmem>>, vector<8x64xf32>
    %c0_19 = arith.constant 0 : index
    %c0_20 = arith.constant 0 : index
    %18 = vector.load %arg11[%c0_19, %c0_20] : memref<8x64xf32, #tpu.memory_space<vmem>>, vector<8x64xf32>
    %19 = vector.extract_strided_slice %17 {offsets = [0, 0], sizes = [8, 32], strides = [1, 1]} : vector<8x64xf32> to vector<8x32xf32>
    %20 = vector.extract_strided_slice %17 {offsets = [0, 32], sizes = [8, 32], strides = [1, 1]} : vector<8x64xf32> to vector<8x32xf32>
    %cst_21 = arith.constant dense<0.000000e+00> : vector<8x256xf32>
    %21 = tpu.matmul %16, %15, %cst_21 {dimension_numbers = #tpu.dot_dimension_numbers<[1], [0], [0], [1], [0, 0, 1, 1], [], []>} : vector<8x64xf32>, vector<64x256xf32>, vector<8x256xf32> -> vector<8x256xf32>
    %22 = vector.extract_strided_slice %8 {offsets = [0, 0], sizes = [8, 128], strides = [1, 1]} : vector<64x128xf32> to vector<8x128xf32>
    %23 = vector.extract_strided_slice %21 {offsets = [0, 0], sizes = [8, 128], strides = [1, 1]} : vector<8x256xf32> to vector<8x128xf32>
    %24 = arith.addf %22, %23 : vector<8x128xf32>
    %25 = vector.extract_strided_slice %14 {offsets = [56, 0], sizes = [8, 128], strides = [1, 1]} : vector<64x128xf32> to vector<8x128xf32>
    %26 = vector.extract_strided_slice %21 {offsets = [0, 128], sizes = [8, 128], strides = [1, 1]} : vector<8x256xf32> to vector<8x128xf32>
    %27 = arith.addf %25, %26 : vector<8x128xf32>
    %28 = vector.extract_strided_slice %24 {offsets = [0, 0], sizes = [8, 96], strides = [1, 1]} : vector<8x128xf32> to vector<8x96xf32>
    %29 = arith.negf %28 : vector<8x96xf32>
    %30 = math.exp %29 : vector<8x96xf32>
    %cst_22 = arith.constant 1.000000e+00 : f32
    %31 = vector.broadcast %cst_22 : f32 to vector<8x96xf32>
    %32 = arith.addf %31, %30 : vector<8x96xf32>
    %33 = arith.divf %31, %32 : vector<8x96xf32>
    %34 = vector.extract_strided_slice %27 {offsets = [0, 0], sizes = [8, 96], strides = [1, 1]} : vector<8x128xf32> to vector<8x96xf32>
    %35 = arith.negf %34 : vector<8x96xf32>
    %36 = math.exp %35 : vector<8x96xf32>
    %cst_23 = arith.constant 1.000000e+00 : f32
    %37 = vector.broadcast %cst_23 : f32 to vector<8x96xf32>
    %38 = arith.addf %37, %36 : vector<8x96xf32>
    %39 = arith.divf %37, %38 : vector<8x96xf32>
    %40 = vector.extract_strided_slice %24 {offsets = [0, 96], sizes = [8, 32], strides = [1, 1]} : vector<8x128xf32> to vector<8x32xf32>
    %41 = math.tanh %40 : vector<8x32xf32>
    %42 = vector.extract_strided_slice %27 {offsets = [0, 96], sizes = [8, 32], strides = [1, 1]} : vector<8x128xf32> to vector<8x32xf32>
    %43 = math.tanh %42 : vector<8x32xf32>
    %44 = vector.extract_strided_slice %33 {offsets = [0, 32], sizes = [8, 32], strides = [1, 1]} : vector<8x96xf32> to vector<8x32xf32>
    %45 = arith.mulf %44, %19 : vector<8x32xf32>
    %46 = vector.extract_strided_slice %33 {offsets = [0, 0], sizes = [8, 32], strides = [1, 1]} : vector<8x96xf32> to vector<8x32xf32>
    %47 = arith.mulf %46, %41 : vector<8x32xf32>
    %48 = arith.addf %45, %47 : vector<8x32xf32>
    %49 = vector.extract_strided_slice %39 {offsets = [0, 32], sizes = [8, 32], strides = [1, 1]} : vector<8x96xf32> to vector<8x32xf32>
    %50 = arith.mulf %49, %20 : vector<8x32xf32>
    %51 = vector.extract_strided_slice %39 {offsets = [0, 0], sizes = [8, 32], strides = [1, 1]} : vector<8x96xf32> to vector<8x32xf32>
    %52 = arith.mulf %51, %43 : vector<8x32xf32>
    %53 = arith.addf %50, %52 : vector<8x32xf32>
    %54 = vector.extract_strided_slice %33 {offsets = [0, 64], sizes = [8, 32], strides = [1, 1]} : vector<8x96xf32> to vector<8x32xf32>
    %55 = math.tanh %48 : vector<8x32xf32>
    %56 = arith.mulf %54, %55 : vector<8x32xf32>
    %57 = vector.extract_strided_slice %39 {offsets = [0, 64], sizes = [8, 32], strides = [1, 1]} : vector<8x96xf32> to vector<8x32xf32>
    %58 = math.tanh %53 : vector<8x32xf32>
    %59 = arith.mulf %57, %58 : vector<8x32xf32>
    %60 = tpu.concatenate %56, %59 in 1 : vector<8x32xf32>, vector<8x32xf32> -> vector<8x64xf32>
    %61 = arith.addf %18, %60 : vector<8x64xf32>
    %cst_24 = arith.constant dense<0.000000e+00> : vector<8x256xf32>
    %62 = tpu.matmul %60, %15, %cst_24 {dimension_numbers = #tpu.dot_dimension_numbers<[1], [0], [0], [1], [0, 0, 1, 1], [], []>} : vector<8x64xf32>, vector<64x256xf32>, vector<8x256xf32> -> vector<8x256xf32>
    %63 = vector.extract_strided_slice %8 {offsets = [8, 0], sizes = [8, 128], strides = [1, 1]} : vector<64x128xf32> to vector<8x128xf32>
    %64 = vector.extract_strided_slice %62 {offsets = [0, 0], sizes = [8, 128], strides = [1, 1]} : vector<8x256xf32> to vector<8x128xf32>
    %65 = arith.addf %63, %64 : vector<8x128xf32>
    %66 = vector.extract_strided_slice %14 {offsets = [48, 0], sizes = [8, 128], strides = [1, 1]} : vector<64x128xf32> to vector<8x128xf32>
    %67 = vector.extract_strided_slice %62 {offsets = [0, 128], sizes = [8, 128], strides = [1, 1]} : vector<8x256xf32> to vector<8x128xf32>
    %68 = arith.addf %66, %67 : vector<8x128xf32>
    %69 = vector.extract_strided_slice %65 {offsets = [0, 0], sizes = [8, 96], strides = [1, 1]} : vector<8x128xf32> to vector<8x96xf32>
    %70 = arith.negf %69 : vector<8x96xf32>
    %71 = math.exp %70 : vector<8x96xf32>
    %cst_25 = arith.constant 1.000000e+00 : f32
    %72 = vector.broadcast %cst_25 : f32 to vector<8x96xf32>
    %73 = arith.addf %72, %71 : vector<8x96xf32>
    %74 = arith.divf %72, %73 : vector<8x96xf32>
    %75 = vector.extract_strided_slice %68 {offsets = [0, 0], sizes = [8, 96], strides = [1, 1]} : vector<8x128xf32> to vector<8x96xf32>
    %76 = arith.negf %75 : vector<8x96xf32>
    %77 = math.exp %76 : vector<8x96xf32>
    %cst_26 = arith.constant 1.000000e+00 : f32
    %78 = vector.broadcast %cst_26 : f32 to vector<8x96xf32>
    %79 = arith.addf %78, %77 : vector<8x96xf32>
    %80 = arith.divf %78, %79 : vector<8x96xf32>
    %81 = vector.extract_strided_slice %65 {offsets = [0, 96], sizes = [8, 32], strides = [1, 1]} : vector<8x128xf32> to vector<8x32xf32>
    %82 = math.tanh %81 : vector<8x32xf32>
    %83 = vector.extract_strided_slice %68 {offsets = [0, 96], sizes = [8, 32], strides = [1, 1]} : vector<8x128xf32> to vector<8x32xf32>
    %84 = math.tanh %83 : vector<8x32xf32>
    %85 = vector.extract_strided_slice %74 {offsets = [0, 32], sizes = [8, 32], strides = [1, 1]} : vector<8x96xf32> to vector<8x32xf32>
    %86 = arith.mulf %85, %48 : vector<8x32xf32>
    %87 = vector.extract_strided_slice %74 {offsets = [0, 0], sizes = [8, 32], strides = [1, 1]} : vector<8x96xf32> to vector<8x32xf32>
    %88 = arith.mulf %87, %82 : vector<8x32xf32>
    %89 = arith.addf %86, %88 : vector<8x32xf32>
    %90 = vector.extract_strided_slice %80 {offsets = [0, 32], sizes = [8, 32], strides = [1, 1]} : vector<8x96xf32> to vector<8x32xf32>
    %91 = arith.mulf %90, %53 : vector<8x32xf32>
    %92 = vector.extract_strided_slice %80 {offsets = [0, 0], sizes = [8, 32], strides = [1, 1]} : vector<8x96xf32> to vector<8x32xf32>
    %93 = arith.mulf %92, %84 : vector<8x32xf32>
    %94 = arith.addf %91, %93 : vector<8x32xf32>
    %95 = vector.extract_strided_slice %74 {offsets = [0, 64], sizes = [8, 32], strides = [1, 1]} : vector<8x96xf32> to vector<8x32xf32>
    %96 = math.tanh %89 : vector<8x32xf32>
    %97 = arith.mulf %95, %96 : vector<8x32xf32>
    %98 = vector.extract_strided_slice %80 {offsets = [0, 64], sizes = [8, 32], strides = [1, 1]} : vector<8x96xf32> to vector<8x32xf32>
    %99 = math.tanh %94 : vector<8x32xf32>
    %100 = arith.mulf %98, %99 : vector<8x32xf32>
    %101 = tpu.concatenate %97, %100 in 1 : vector<8x32xf32>, vector<8x32xf32> -> vector<8x64xf32>
    %102 = arith.addf %61, %101 : vector<8x64xf32>
    %cst_27 = arith.constant dense<0.000000e+00> : vector<8x256xf32>
    %103 = tpu.matmul %101, %15, %cst_27 {dimension_numbers = #tpu.dot_dimension_numbers<[1], [0], [0], [1], [0, 0, 1, 1], [], []>} : vector<8x64xf32>, vector<64x256xf32>, vector<8x256xf32> -> vector<8x256xf32>
    %104 = vector.extract_strided_slice %8 {offsets = [16, 0], sizes = [8, 128], strides = [1, 1]} : vector<64x128xf32> to vector<8x128xf32>
    %105 = vector.extract_strided_slice %103 {offsets = [0, 0], sizes = [8, 128], strides = [1, 1]} : vector<8x256xf32> to vector<8x128xf32>
    %106 = arith.addf %104, %105 : vector<8x128xf32>
    %107 = vector.extract_strided_slice %14 {offsets = [40, 0], sizes = [8, 128], strides = [1, 1]} : vector<64x128xf32> to vector<8x128xf32>
    %108 = vector.extract_strided_slice %103 {offsets = [0, 128], sizes = [8, 128], strides = [1, 1]} : vector<8x256xf32> to vector<8x128xf32>
    %109 = arith.addf %107, %108 : vector<8x128xf32>
    %110 = vector.extract_strided_slice %106 {offsets = [0, 0], sizes = [8, 96], strides = [1, 1]} : vector<8x128xf32> to vector<8x96xf32>
    %111 = arith.negf %110 : vector<8x96xf32>
    %112 = math.exp %111 : vector<8x96xf32>
    %cst_28 = arith.constant 1.000000e+00 : f32
    %113 = vector.broadcast %cst_28 : f32 to vector<8x96xf32>
    %114 = arith.addf %113, %112 : vector<8x96xf32>
    %115 = arith.divf %113, %114 : vector<8x96xf32>
    %116 = vector.extract_strided_slice %109 {offsets = [0, 0], sizes = [8, 96], strides = [1, 1]} : vector<8x128xf32> to vector<8x96xf32>
    %117 = arith.negf %116 : vector<8x96xf32>
    %118 = math.exp %117 : vector<8x96xf32>
    %cst_29 = arith.constant 1.000000e+00 : f32
    %119 = vector.broadcast %cst_29 : f32 to vector<8x96xf32>
    %120 = arith.addf %119, %118 : vector<8x96xf32>
    %121 = arith.divf %119, %120 : vector<8x96xf32>
    %122 = vector.extract_strided_slice %106 {offsets = [0, 96], sizes = [8, 32], strides = [1, 1]} : vector<8x128xf32> to vector<8x32xf32>
    %123 = math.tanh %122 : vector<8x32xf32>
    %124 = vector.extract_strided_slice %109 {offsets = [0, 96], sizes = [8, 32], strides = [1, 1]} : vector<8x128xf32> to vector<8x32xf32>
    %125 = math.tanh %124 : vector<8x32xf32>
    %126 = vector.extract_strided_slice %115 {offsets = [0, 32], sizes = [8, 32], strides = [1, 1]} : vector<8x96xf32> to vector<8x32xf32>
    %127 = arith.mulf %126, %89 : vector<8x32xf32>
    %128 = vector.extract_strided_slice %115 {offsets = [0, 0], sizes = [8, 32], strides = [1, 1]} : vector<8x96xf32> to vector<8x32xf32>
    %129 = arith.mulf %128, %123 : vector<8x32xf32>
    %130 = arith.addf %127, %129 : vector<8x32xf32>
    %131 = vector.extract_strided_slice %121 {offsets = [0, 32], sizes = [8, 32], strides = [1, 1]} : vector<8x96xf32> to vector<8x32xf32>
    %132 = arith.mulf %131, %94 : vector<8x32xf32>
    %133 = vector.extract_strided_slice %121 {offsets = [0, 0], sizes = [8, 32], strides = [1, 1]} : vector<8x96xf32> to vector<8x32xf32>
    %134 = arith.mulf %133, %125 : vector<8x32xf32>
    %135 = arith.addf %132, %134 : vector<8x32xf32>
    %136 = vector.extract_strided_slice %115 {offsets = [0, 64], sizes = [8, 32], strides = [1, 1]} : vector<8x96xf32> to vector<8x32xf32>
    %137 = math.tanh %130 : vector<8x32xf32>
    %138 = arith.mulf %136, %137 : vector<8x32xf32>
    %139 = vector.extract_strided_slice %121 {offsets = [0, 64], sizes = [8, 32], strides = [1, 1]} : vector<8x96xf32> to vector<8x32xf32>
    %140 = math.tanh %135 : vector<8x32xf32>
    %141 = arith.mulf %139, %140 : vector<8x32xf32>
    %142 = tpu.concatenate %138, %141 in 1 : vector<8x32xf32>, vector<8x32xf32> -> vector<8x64xf32>
    %143 = arith.addf %102, %142 : vector<8x64xf32>
    %cst_30 = arith.constant dense<0.000000e+00> : vector<8x256xf32>
    %144 = tpu.matmul %142, %15, %cst_30 {dimension_numbers = #tpu.dot_dimension_numbers<[1], [0], [0], [1], [0, 0, 1, 1], [], []>} : vector<8x64xf32>, vector<64x256xf32>, vector<8x256xf32> -> vector<8x256xf32>
    %145 = vector.extract_strided_slice %8 {offsets = [24, 0], sizes = [8, 128], strides = [1, 1]} : vector<64x128xf32> to vector<8x128xf32>
    %146 = vector.extract_strided_slice %144 {offsets = [0, 0], sizes = [8, 128], strides = [1, 1]} : vector<8x256xf32> to vector<8x128xf32>
    %147 = arith.addf %145, %146 : vector<8x128xf32>
    %148 = vector.extract_strided_slice %14 {offsets = [32, 0], sizes = [8, 128], strides = [1, 1]} : vector<64x128xf32> to vector<8x128xf32>
    %149 = vector.extract_strided_slice %144 {offsets = [0, 128], sizes = [8, 128], strides = [1, 1]} : vector<8x256xf32> to vector<8x128xf32>
    %150 = arith.addf %148, %149 : vector<8x128xf32>
    %151 = vector.extract_strided_slice %147 {offsets = [0, 0], sizes = [8, 96], strides = [1, 1]} : vector<8x128xf32> to vector<8x96xf32>
    %152 = arith.negf %151 : vector<8x96xf32>
    %153 = math.exp %152 : vector<8x96xf32>
    %cst_31 = arith.constant 1.000000e+00 : f32
    %154 = vector.broadcast %cst_31 : f32 to vector<8x96xf32>
    %155 = arith.addf %154, %153 : vector<8x96xf32>
    %156 = arith.divf %154, %155 : vector<8x96xf32>
    %157 = vector.extract_strided_slice %150 {offsets = [0, 0], sizes = [8, 96], strides = [1, 1]} : vector<8x128xf32> to vector<8x96xf32>
    %158 = arith.negf %157 : vector<8x96xf32>
    %159 = math.exp %158 : vector<8x96xf32>
    %cst_32 = arith.constant 1.000000e+00 : f32
    %160 = vector.broadcast %cst_32 : f32 to vector<8x96xf32>
    %161 = arith.addf %160, %159 : vector<8x96xf32>
    %162 = arith.divf %160, %161 : vector<8x96xf32>
    %163 = vector.extract_strided_slice %147 {offsets = [0, 96], sizes = [8, 32], strides = [1, 1]} : vector<8x128xf32> to vector<8x32xf32>
    %164 = math.tanh %163 : vector<8x32xf32>
    %165 = vector.extract_strided_slice %150 {offsets = [0, 96], sizes = [8, 32], strides = [1, 1]} : vector<8x128xf32> to vector<8x32xf32>
    %166 = math.tanh %165 : vector<8x32xf32>
    %167 = vector.extract_strided_slice %156 {offsets = [0, 32], sizes = [8, 32], strides = [1, 1]} : vector<8x96xf32> to vector<8x32xf32>
    %168 = arith.mulf %167, %130 : vector<8x32xf32>
    %169 = vector.extract_strided_slice %156 {offsets = [0, 0], sizes = [8, 32], strides = [1, 1]} : vector<8x96xf32> to vector<8x32xf32>
    %170 = arith.mulf %169, %164 : vector<8x32xf32>
    %171 = arith.addf %168, %170 : vector<8x32xf32>
    %172 = vector.extract_strided_slice %162 {offsets = [0, 32], sizes = [8, 32], strides = [1, 1]} : vector<8x96xf32> to vector<8x32xf32>
    %173 = arith.mulf %172, %135 : vector<8x32xf32>
    %174 = vector.extract_strided_slice %162 {offsets = [0, 0], sizes = [8, 32], strides = [1, 1]} : vector<8x96xf32> to vector<8x32xf32>
    %175 = arith.mulf %174, %166 : vector<8x32xf32>
    %176 = arith.addf %173, %175 : vector<8x32xf32>
    %177 = vector.extract_strided_slice %156 {offsets = [0, 64], sizes = [8, 32], strides = [1, 1]} : vector<8x96xf32> to vector<8x32xf32>
    %178 = math.tanh %171 : vector<8x32xf32>
    %179 = arith.mulf %177, %178 : vector<8x32xf32>
    %180 = vector.extract_strided_slice %162 {offsets = [0, 64], sizes = [8, 32], strides = [1, 1]} : vector<8x96xf32> to vector<8x32xf32>
    %181 = math.tanh %176 : vector<8x32xf32>
    %182 = arith.mulf %180, %181 : vector<8x32xf32>
    %183 = tpu.concatenate %179, %182 in 1 : vector<8x32xf32>, vector<8x32xf32> -> vector<8x64xf32>
    %184 = arith.addf %143, %183 : vector<8x64xf32>
    %cst_33 = arith.constant dense<0.000000e+00> : vector<8x256xf32>
    %185 = tpu.matmul %183, %15, %cst_33 {dimension_numbers = #tpu.dot_dimension_numbers<[1], [0], [0], [1], [0, 0, 1, 1], [], []>} : vector<8x64xf32>, vector<64x256xf32>, vector<8x256xf32> -> vector<8x256xf32>
    %186 = vector.extract_strided_slice %8 {offsets = [32, 0], sizes = [8, 128], strides = [1, 1]} : vector<64x128xf32> to vector<8x128xf32>
    %187 = vector.extract_strided_slice %185 {offsets = [0, 0], sizes = [8, 128], strides = [1, 1]} : vector<8x256xf32> to vector<8x128xf32>
    %188 = arith.addf %186, %187 : vector<8x128xf32>
    %189 = vector.extract_strided_slice %14 {offsets = [24, 0], sizes = [8, 128], strides = [1, 1]} : vector<64x128xf32> to vector<8x128xf32>
    %190 = vector.extract_strided_slice %185 {offsets = [0, 128], sizes = [8, 128], strides = [1, 1]} : vector<8x256xf32> to vector<8x128xf32>
    %191 = arith.addf %189, %190 : vector<8x128xf32>
    %192 = vector.extract_strided_slice %188 {offsets = [0, 0], sizes = [8, 96], strides = [1, 1]} : vector<8x128xf32> to vector<8x96xf32>
    %193 = arith.negf %192 : vector<8x96xf32>
    %194 = math.exp %193 : vector<8x96xf32>
    %cst_34 = arith.constant 1.000000e+00 : f32
    %195 = vector.broadcast %cst_34 : f32 to vector<8x96xf32>
    %196 = arith.addf %195, %194 : vector<8x96xf32>
    %197 = arith.divf %195, %196 : vector<8x96xf32>
    %198 = vector.extract_strided_slice %191 {offsets = [0, 0], sizes = [8, 96], strides = [1, 1]} : vector<8x128xf32> to vector<8x96xf32>
    %199 = arith.negf %198 : vector<8x96xf32>
    %200 = math.exp %199 : vector<8x96xf32>
    %cst_35 = arith.constant 1.000000e+00 : f32
    %201 = vector.broadcast %cst_35 : f32 to vector<8x96xf32>
    %202 = arith.addf %201, %200 : vector<8x96xf32>
    %203 = arith.divf %201, %202 : vector<8x96xf32>
    %204 = vector.extract_strided_slice %188 {offsets = [0, 96], sizes = [8, 32], strides = [1, 1]} : vector<8x128xf32> to vector<8x32xf32>
    %205 = math.tanh %204 : vector<8x32xf32>
    %206 = vector.extract_strided_slice %191 {offsets = [0, 96], sizes = [8, 32], strides = [1, 1]} : vector<8x128xf32> to vector<8x32xf32>
    %207 = math.tanh %206 : vector<8x32xf32>
    %208 = vector.extract_strided_slice %197 {offsets = [0, 32], sizes = [8, 32], strides = [1, 1]} : vector<8x96xf32> to vector<8x32xf32>
    %209 = arith.mulf %208, %171 : vector<8x32xf32>
    %210 = vector.extract_strided_slice %197 {offsets = [0, 0], sizes = [8, 32], strides = [1, 1]} : vector<8x96xf32> to vector<8x32xf32>
    %211 = arith.mulf %210, %205 : vector<8x32xf32>
    %212 = arith.addf %209, %211 : vector<8x32xf32>
    %213 = vector.extract_strided_slice %203 {offsets = [0, 32], sizes = [8, 32], strides = [1, 1]} : vector<8x96xf32> to vector<8x32xf32>
    %214 = arith.mulf %213, %176 : vector<8x32xf32>
    %215 = vector.extract_strided_slice %203 {offsets = [0, 0], sizes = [8, 32], strides = [1, 1]} : vector<8x96xf32> to vector<8x32xf32>
    %216 = arith.mulf %215, %207 : vector<8x32xf32>
    %217 = arith.addf %214, %216 : vector<8x32xf32>
    %218 = vector.extract_strided_slice %197 {offsets = [0, 64], sizes = [8, 32], strides = [1, 1]} : vector<8x96xf32> to vector<8x32xf32>
    %219 = math.tanh %212 : vector<8x32xf32>
    %220 = arith.mulf %218, %219 : vector<8x32xf32>
    %221 = vector.extract_strided_slice %203 {offsets = [0, 64], sizes = [8, 32], strides = [1, 1]} : vector<8x96xf32> to vector<8x32xf32>
    %222 = math.tanh %217 : vector<8x32xf32>
    %223 = arith.mulf %221, %222 : vector<8x32xf32>
    %224 = tpu.concatenate %220, %223 in 1 : vector<8x32xf32>, vector<8x32xf32> -> vector<8x64xf32>
    %225 = arith.addf %184, %224 : vector<8x64xf32>
    %cst_36 = arith.constant dense<0.000000e+00> : vector<8x256xf32>
    %226 = tpu.matmul %224, %15, %cst_36 {dimension_numbers = #tpu.dot_dimension_numbers<[1], [0], [0], [1], [0, 0, 1, 1], [], []>} : vector<8x64xf32>, vector<64x256xf32>, vector<8x256xf32> -> vector<8x256xf32>
    %227 = vector.extract_strided_slice %8 {offsets = [40, 0], sizes = [8, 128], strides = [1, 1]} : vector<64x128xf32> to vector<8x128xf32>
    %228 = vector.extract_strided_slice %226 {offsets = [0, 0], sizes = [8, 128], strides = [1, 1]} : vector<8x256xf32> to vector<8x128xf32>
    %229 = arith.addf %227, %228 : vector<8x128xf32>
    %230 = vector.extract_strided_slice %14 {offsets = [16, 0], sizes = [8, 128], strides = [1, 1]} : vector<64x128xf32> to vector<8x128xf32>
    %231 = vector.extract_strided_slice %226 {offsets = [0, 128], sizes = [8, 128], strides = [1, 1]} : vector<8x256xf32> to vector<8x128xf32>
    %232 = arith.addf %230, %231 : vector<8x128xf32>
    %233 = vector.extract_strided_slice %229 {offsets = [0, 0], sizes = [8, 96], strides = [1, 1]} : vector<8x128xf32> to vector<8x96xf32>
    %234 = arith.negf %233 : vector<8x96xf32>
    %235 = math.exp %234 : vector<8x96xf32>
    %cst_37 = arith.constant 1.000000e+00 : f32
    %236 = vector.broadcast %cst_37 : f32 to vector<8x96xf32>
    %237 = arith.addf %236, %235 : vector<8x96xf32>
    %238 = arith.divf %236, %237 : vector<8x96xf32>
    %239 = vector.extract_strided_slice %232 {offsets = [0, 0], sizes = [8, 96], strides = [1, 1]} : vector<8x128xf32> to vector<8x96xf32>
    %240 = arith.negf %239 : vector<8x96xf32>
    %241 = math.exp %240 : vector<8x96xf32>
    %cst_38 = arith.constant 1.000000e+00 : f32
    %242 = vector.broadcast %cst_38 : f32 to vector<8x96xf32>
    %243 = arith.addf %242, %241 : vector<8x96xf32>
    %244 = arith.divf %242, %243 : vector<8x96xf32>
    %245 = vector.extract_strided_slice %229 {offsets = [0, 96], sizes = [8, 32], strides = [1, 1]} : vector<8x128xf32> to vector<8x32xf32>
    %246 = math.tanh %245 : vector<8x32xf32>
    %247 = vector.extract_strided_slice %232 {offsets = [0, 96], sizes = [8, 32], strides = [1, 1]} : vector<8x128xf32> to vector<8x32xf32>
    %248 = math.tanh %247 : vector<8x32xf32>
    %249 = vector.extract_strided_slice %238 {offsets = [0, 32], sizes = [8, 32], strides = [1, 1]} : vector<8x96xf32> to vector<8x32xf32>
    %250 = arith.mulf %249, %212 : vector<8x32xf32>
    %251 = vector.extract_strided_slice %238 {offsets = [0, 0], sizes = [8, 32], strides = [1, 1]} : vector<8x96xf32> to vector<8x32xf32>
    %252 = arith.mulf %251, %246 : vector<8x32xf32>
    %253 = arith.addf %250, %252 : vector<8x32xf32>
    %254 = vector.extract_strided_slice %244 {offsets = [0, 32], sizes = [8, 32], strides = [1, 1]} : vector<8x96xf32> to vector<8x32xf32>
    %255 = arith.mulf %254, %217 : vector<8x32xf32>
    %256 = vector.extract_strided_slice %244 {offsets = [0, 0], sizes = [8, 32], strides = [1, 1]} : vector<8x96xf32> to vector<8x32xf32>
    %257 = arith.mulf %256, %248 : vector<8x32xf32>
    %258 = arith.addf %255, %257 : vector<8x32xf32>
    %259 = vector.extract_strided_slice %238 {offsets = [0, 64], sizes = [8, 32], strides = [1, 1]} : vector<8x96xf32> to vector<8x32xf32>
    %260 = math.tanh %253 : vector<8x32xf32>
    %261 = arith.mulf %259, %260 : vector<8x32xf32>
    %262 = vector.extract_strided_slice %244 {offsets = [0, 64], sizes = [8, 32], strides = [1, 1]} : vector<8x96xf32> to vector<8x32xf32>
    %263 = math.tanh %258 : vector<8x32xf32>
    %264 = arith.mulf %262, %263 : vector<8x32xf32>
    %265 = tpu.concatenate %261, %264 in 1 : vector<8x32xf32>, vector<8x32xf32> -> vector<8x64xf32>
    %266 = arith.addf %225, %265 : vector<8x64xf32>
    %cst_39 = arith.constant dense<0.000000e+00> : vector<8x256xf32>
    %267 = tpu.matmul %265, %15, %cst_39 {dimension_numbers = #tpu.dot_dimension_numbers<[1], [0], [0], [1], [0, 0, 1, 1], [], []>} : vector<8x64xf32>, vector<64x256xf32>, vector<8x256xf32> -> vector<8x256xf32>
    %268 = vector.extract_strided_slice %8 {offsets = [48, 0], sizes = [8, 128], strides = [1, 1]} : vector<64x128xf32> to vector<8x128xf32>
    %269 = vector.extract_strided_slice %267 {offsets = [0, 0], sizes = [8, 128], strides = [1, 1]} : vector<8x256xf32> to vector<8x128xf32>
    %270 = arith.addf %268, %269 : vector<8x128xf32>
    %271 = vector.extract_strided_slice %14 {offsets = [8, 0], sizes = [8, 128], strides = [1, 1]} : vector<64x128xf32> to vector<8x128xf32>
    %272 = vector.extract_strided_slice %267 {offsets = [0, 128], sizes = [8, 128], strides = [1, 1]} : vector<8x256xf32> to vector<8x128xf32>
    %273 = arith.addf %271, %272 : vector<8x128xf32>
    %274 = vector.extract_strided_slice %270 {offsets = [0, 0], sizes = [8, 96], strides = [1, 1]} : vector<8x128xf32> to vector<8x96xf32>
    %275 = arith.negf %274 : vector<8x96xf32>
    %276 = math.exp %275 : vector<8x96xf32>
    %cst_40 = arith.constant 1.000000e+00 : f32
    %277 = vector.broadcast %cst_40 : f32 to vector<8x96xf32>
    %278 = arith.addf %277, %276 : vector<8x96xf32>
    %279 = arith.divf %277, %278 : vector<8x96xf32>
    %280 = vector.extract_strided_slice %273 {offsets = [0, 0], sizes = [8, 96], strides = [1, 1]} : vector<8x128xf32> to vector<8x96xf32>
    %281 = arith.negf %280 : vector<8x96xf32>
    %282 = math.exp %281 : vector<8x96xf32>
    %cst_41 = arith.constant 1.000000e+00 : f32
    %283 = vector.broadcast %cst_41 : f32 to vector<8x96xf32>
    %284 = arith.addf %283, %282 : vector<8x96xf32>
    %285 = arith.divf %283, %284 : vector<8x96xf32>
    %286 = vector.extract_strided_slice %270 {offsets = [0, 96], sizes = [8, 32], strides = [1, 1]} : vector<8x128xf32> to vector<8x32xf32>
    %287 = math.tanh %286 : vector<8x32xf32>
    %288 = vector.extract_strided_slice %273 {offsets = [0, 96], sizes = [8, 32], strides = [1, 1]} : vector<8x128xf32> to vector<8x32xf32>
    %289 = math.tanh %288 : vector<8x32xf32>
    %290 = vector.extract_strided_slice %279 {offsets = [0, 32], sizes = [8, 32], strides = [1, 1]} : vector<8x96xf32> to vector<8x32xf32>
    %291 = arith.mulf %290, %253 : vector<8x32xf32>
    %292 = vector.extract_strided_slice %279 {offsets = [0, 0], sizes = [8, 32], strides = [1, 1]} : vector<8x96xf32> to vector<8x32xf32>
    %293 = arith.mulf %292, %287 : vector<8x32xf32>
    %294 = arith.addf %291, %293 : vector<8x32xf32>
    %295 = vector.extract_strided_slice %285 {offsets = [0, 32], sizes = [8, 32], strides = [1, 1]} : vector<8x96xf32> to vector<8x32xf32>
    %296 = arith.mulf %295, %258 : vector<8x32xf32>
    %297 = vector.extract_strided_slice %285 {offsets = [0, 0], sizes = [8, 32], strides = [1, 1]} : vector<8x96xf32> to vector<8x32xf32>
    %298 = arith.mulf %297, %289 : vector<8x32xf32>
    %299 = arith.addf %296, %298 : vector<8x32xf32>
    %300 = vector.extract_strided_slice %279 {offsets = [0, 64], sizes = [8, 32], strides = [1, 1]} : vector<8x96xf32> to vector<8x32xf32>
    %301 = math.tanh %294 : vector<8x32xf32>
    %302 = arith.mulf %300, %301 : vector<8x32xf32>
    %303 = vector.extract_strided_slice %285 {offsets = [0, 64], sizes = [8, 32], strides = [1, 1]} : vector<8x96xf32> to vector<8x32xf32>
    %304 = math.tanh %299 : vector<8x32xf32>
    %305 = arith.mulf %303, %304 : vector<8x32xf32>
    %306 = tpu.concatenate %302, %305 in 1 : vector<8x32xf32>, vector<8x32xf32> -> vector<8x64xf32>
    %307 = arith.addf %266, %306 : vector<8x64xf32>
    %cst_42 = arith.constant dense<0.000000e+00> : vector<8x256xf32>
    %308 = tpu.matmul %306, %15, %cst_42 {dimension_numbers = #tpu.dot_dimension_numbers<[1], [0], [0], [1], [0, 0, 1, 1], [], []>} : vector<8x64xf32>, vector<64x256xf32>, vector<8x256xf32> -> vector<8x256xf32>
    %309 = vector.extract_strided_slice %8 {offsets = [56, 0], sizes = [8, 128], strides = [1, 1]} : vector<64x128xf32> to vector<8x128xf32>
    %310 = vector.extract_strided_slice %308 {offsets = [0, 0], sizes = [8, 128], strides = [1, 1]} : vector<8x256xf32> to vector<8x128xf32>
    %311 = arith.addf %309, %310 : vector<8x128xf32>
    %312 = vector.extract_strided_slice %14 {offsets = [0, 0], sizes = [8, 128], strides = [1, 1]} : vector<64x128xf32> to vector<8x128xf32>
    %313 = vector.extract_strided_slice %308 {offsets = [0, 128], sizes = [8, 128], strides = [1, 1]} : vector<8x256xf32> to vector<8x128xf32>
    %314 = arith.addf %312, %313 : vector<8x128xf32>
    %315 = vector.extract_strided_slice %311 {offsets = [0, 0], sizes = [8, 96], strides = [1, 1]} : vector<8x128xf32> to vector<8x96xf32>
    %316 = arith.negf %315 : vector<8x96xf32>
    %317 = math.exp %316 : vector<8x96xf32>
    %cst_43 = arith.constant 1.000000e+00 : f32
    %318 = vector.broadcast %cst_43 : f32 to vector<8x96xf32>
    %319 = arith.addf %318, %317 : vector<8x96xf32>
    %320 = arith.divf %318, %319 : vector<8x96xf32>
    %321 = vector.extract_strided_slice %314 {offsets = [0, 0], sizes = [8, 96], strides = [1, 1]} : vector<8x128xf32> to vector<8x96xf32>
    %322 = arith.negf %321 : vector<8x96xf32>
    %323 = math.exp %322 : vector<8x96xf32>
    %cst_44 = arith.constant 1.000000e+00 : f32
    %324 = vector.broadcast %cst_44 : f32 to vector<8x96xf32>
    %325 = arith.addf %324, %323 : vector<8x96xf32>
    %326 = arith.divf %324, %325 : vector<8x96xf32>
    %327 = vector.extract_strided_slice %311 {offsets = [0, 96], sizes = [8, 32], strides = [1, 1]} : vector<8x128xf32> to vector<8x32xf32>
    %328 = math.tanh %327 : vector<8x32xf32>
    %329 = vector.extract_strided_slice %314 {offsets = [0, 96], sizes = [8, 32], strides = [1, 1]} : vector<8x128xf32> to vector<8x32xf32>
    %330 = math.tanh %329 : vector<8x32xf32>
    %331 = vector.extract_strided_slice %320 {offsets = [0, 32], sizes = [8, 32], strides = [1, 1]} : vector<8x96xf32> to vector<8x32xf32>
    %332 = arith.mulf %331, %294 : vector<8x32xf32>
    %333 = vector.extract_strided_slice %320 {offsets = [0, 0], sizes = [8, 32], strides = [1, 1]} : vector<8x96xf32> to vector<8x32xf32>
    %334 = arith.mulf %333, %328 : vector<8x32xf32>
    %335 = arith.addf %332, %334 : vector<8x32xf32>
    %336 = vector.extract_strided_slice %326 {offsets = [0, 32], sizes = [8, 32], strides = [1, 1]} : vector<8x96xf32> to vector<8x32xf32>
    %337 = arith.mulf %336, %299 : vector<8x32xf32>
    %338 = vector.extract_strided_slice %326 {offsets = [0, 0], sizes = [8, 32], strides = [1, 1]} : vector<8x96xf32> to vector<8x32xf32>
    %339 = arith.mulf %338, %330 : vector<8x32xf32>
    %340 = arith.addf %337, %339 : vector<8x32xf32>
    %341 = vector.extract_strided_slice %320 {offsets = [0, 64], sizes = [8, 32], strides = [1, 1]} : vector<8x96xf32> to vector<8x32xf32>
    %342 = math.tanh %335 : vector<8x32xf32>
    %343 = arith.mulf %341, %342 : vector<8x32xf32>
    %344 = vector.extract_strided_slice %326 {offsets = [0, 64], sizes = [8, 32], strides = [1, 1]} : vector<8x96xf32> to vector<8x32xf32>
    %345 = math.tanh %340 : vector<8x32xf32>
    %346 = arith.mulf %344, %345 : vector<8x32xf32>
    %347 = tpu.concatenate %343, %346 in 1 : vector<8x32xf32>, vector<8x32xf32> -> vector<8x64xf32>
    %348 = arith.addf %307, %347 : vector<8x64xf32>
    %c0_45 = arith.constant 0 : index
    %c0_46 = arith.constant 0 : index
    %349 = vector.load %arg9[%c0_45, %c0_46] : memref<8x64xf32, #tpu.memory_space<vmem>>, vector<8x64xf32>
    tpu.vector_store %arg9[%c0_45, %c0_46], %347 {strides = array<i32>} : memref<8x64xf32, #tpu.memory_space<vmem>>, vector<8x64xf32>,
    %350 = tpu.concatenate %335, %340 in 1 : vector<8x32xf32>, vector<8x32xf32> -> vector<8x64xf32>
    %c0_47 = arith.constant 0 : index
    %c0_48 = arith.constant 0 : index
    %351 = vector.load %arg10[%c0_47, %c0_48] : memref<8x64xf32, #tpu.memory_space<vmem>>, vector<8x64xf32>
    tpu.vector_store %arg10[%c0_47, %c0_48], %350 {strides = array<i32>} : memref<8x64xf32, #tpu.memory_space<vmem>>, vector<8x64xf32>,
    %c0_49 = arith.constant 0 : index
    %c0_50 = arith.constant 0 : index
    %352 = vector.load %arg11[%c0_49, %c0_50] : memref<8x64xf32, #tpu.memory_space<vmem>>, vector<8x64xf32>
    tpu.vector_store %arg11[%c0_49, %c0_50], %348 {strides = array<i32>} : memref<8x64xf32, #tpu.memory_space<vmem>>, vector<8x64xf32>,
    %c0_i32_51 = arith.constant 0 : i32
    %353 = arith.cmpi eq, %arg0, %c0_i32_51 : i32
    %354 = arith.extui %353 : i1 to i32
    %c0_i32_52 = arith.constant 0 : i32
    %355 = arith.cmpi ne, %354, %c0_i32_52 : i32
    scf.if %355 {
      %cst_53 = arith.constant 1.250000e-01 : f32
      %356 = vector.broadcast %cst_53 : f32 to vector<8x64xf32>
      %357 = arith.mulf %348, %356 : vector<8x64xf32>
      %c0_54 = arith.constant 0 : index
      %c0_55 = arith.constant 0 : index
      %358 = vector.load %arg8[%c0_54, %c0_55] : memref<8x64xf32, #tpu.memory_space<vmem>>, vector<8x64xf32>
      tpu.vector_store %arg8[%c0_54, %c0_55], %357 {strides = array<i32>} : memref<8x64xf32, #tpu.memory_space<vmem>>, vector<8x64xf32>,
    } else {
    }
    return
  }
  func.func @transform_0(%arg0: i32) -> (i32, i32) {
    %c0_i32 = arith.constant 0 : i32
    %c0_i32_0 = arith.constant 0 : i32
    return %arg0, %c0_i32 : i32, i32
  }
  func.func @transform_1(%arg0: i32) -> (i32, i32) {
    %c0_i32 = arith.constant 0 : i32
    %0 = arith.subi %c0_i32, %arg0 : i32
    %c0_i32_0 = arith.constant 0 : i32
    %c0_i32_1 = arith.constant 0 : i32
    return %0, %c0_i32_0 : i32, i32
  }
  func.func @transform_2(%arg0: i32) -> (i32, i32) {
    %c0_i32 = arith.constant 0 : i32
    %c0_i32_0 = arith.constant 0 : i32
    %c0_i32_1 = arith.constant 0 : i32
    return %c0_i32, %c0_i32_0 : i32, i32
  }
  func.func @transform_3(%arg0: i32) -> (i32, i32) {
    %c0_i32 = arith.constant 0 : i32
    %c0_i32_0 = arith.constant 0 : i32
    %c0_i32_1 = arith.constant 0 : i32
    return %c0_i32, %c0_i32_0 : i32, i32
  }
  func.func @transform_4(%arg0: i32) -> (i32, i32) {
    %c0_i32 = arith.constant 0 : i32
    %c0_i32_0 = arith.constant 0 : i32
    %c0_i32_1 = arith.constant 0 : i32
    return %c0_i32, %c0_i32_0 : i32, i32
  }
  func.func @transform_5(%arg0: i32) -> (i32, i32) {
    %c0_i32 = arith.constant 0 : i32
    %c0_i32_0 = arith.constant 0 : i32
    %c0_i32_1 = arith.constant 0 : i32
    return %c0_i32, %c0_i32_0 : i32, i32
  }
  func.func @transform_6(%arg0: i32) -> (i32, i32) {
    %c0_i32 = arith.constant 0 : i32
    %c0_i32_0 = arith.constant 0 : i32
    %c0_i32_1 = arith.constant 0 : i32
    return %c0_i32, %c0_i32_0 : i32, i32
  }
  func.func @transform_7(%arg0: i32) -> (i32, i32) {
    %c0_i32 = arith.constant 0 : i32
    %c0_i32_0 = arith.constant 0 : i32
    %c0_i32_1 = arith.constant 0 : i32
    return %c0_i32, %c0_i32_0 : i32, i32
  }
}

</mosaic_0001>

<bundles_post_ra>
// kernel: encoder_forward.1
= control target key start
LH: loop header
LB: loop body
LE: loop exit
PB: predicated region body
PF: predicated region fallthrough
CT: control target
= control target key end

     0   :  { %vm97_vm0 = vcmask 1043456   ;;  %vm72_vm1 = vcmask 31744   ;;  %vm52_vm2 = vcmask 523264   ;;  %v1696_v3 = vmov 0.0   ;;  %s2241_s2 = inlined_call_operand.vmem [shape: f32[4,128], index: 2, kind: input, shape index: {}]   ;;  %s2242_s0 = inlined_call_operand.vmem [shape: f32[64,4], index: 0, kind: input, shape index: {}, may-alias: {0,1}]   ;;  %s2243_s4 = inlined_call_operand.vmem [shape: f32[64,256], index: 4, kind: input, shape index: {}]   ;;  %s2244_s3 = inlined_call_operand.vmem [shape: f32[4,128], index: 3, kind: input, shape index: {}]   ;;  %s2245_s1 = inlined_call_operand.vmem [shape: f32[64,4], index: 1, kind: input, shape index: {}, may-alias: {0,1}]   ;;  %s2246_s5 = inlined_call_operand.vmem [shape: f32[1,128], index: 5, kind: input, shape index: {}]   ;;  %s2247_s6 = inlined_call_operand.vmem [shape: f32[1,128], index: 6, kind: input, shape index: {}]   ;;  %s2248_s7 = inlined_call_operand.vmem [shape: f32[8,64], index: 7, kind: output, shape index: {}]  }
   0x1   :  { %v64_v0 = vld [vmem:[%s2241_s2] sm:$0xf]  ;;  %v57_v2 = vld [vmem:[%s2242_s0 + $0x8] sm:$0xff]  ;;  %53 = vst.msk [vmem:[#allocation2] sm:$0xff] %vm52_vm2, %v1696_v3  ;;  %54 = vst.msk [vmem:[#allocation3] sm:$0xff] %vm52_vm2, %v1696_v3  ;;  %vm510_vm3 = vcmask 261120  }
   0x2   :  { %v56_v1 = vld [vmem:[%s2242_s0] sm:$0xff]  ;;  %55 = vst.msk [vmem:[#allocation4] sm:$0xff] %vm52_vm2, %v1696_v3  ;;  %1536 = vmatprep.subr.msk.mxu0 %vm97_vm0, %v64_v0  ;;  %v1760_v4 = vld [vmem:[%s2243_s4 + $0x78] sm:$0xff]  ;;  %v1765_v5 = vld [vmem:[%s2243_s4 + $0x70] sm:$0xff] }
   0x3   :  { %1538 = vmatprep.mubr.msk.f32.mxu0 %vm72_vm1, %v56_v1  ;;  %v214_v6 = vld [vmem:[%s2244_s3] sm:$0xf]  ;;  %1537 = vmatpush3.msk.msra.mxu0 %vm97_vm0, %v64_v0  ;;  %v1775_v7 = vld [vmem:[%s2243_s4 + $0x68] sm:$0xff]  ;;  %v58_v8 = vld [vmem:[%s2242_s0 + $0x10] sm:$0xff] }
   0x4   :  { %1550 = vmatprep.subr.msk.mxu1 %vm97_vm0, %v214_v6  ;;  %1539 = vmatmul.mubr.msk.f32.vlgmr.msra.gmra.mxu0 %vm72_vm1, %v57_v2  ;;  %v206_v9 = vld [vmem:[%s2245_s1] sm:$0xff]  ;;  %v59_v11 = vld [vmem:[%s2242_s0 + $0x18] sm:$0xff]  ;;  %v207_v12 = vld [vmem:[%s2245_s1 + $0x8] sm:$0xff] }
   0x5   :  { %393 = vmatprep.subr.mxu0 %v1760_v4  ;;  %v1788_v10 = vld [vmem:[%s2243_s4 + $0x60] sm:$0xff]  ;;  %1541 = vmatprep.mubr.msk.f32.mxu0 %vm72_vm1, %v58_v8  ;;  %v1803_v13 = vld [vmem:[%s2243_s4 + $0x58] sm:$0xff]  ;;  %v1813_v15 = vld [vmem:[%s2243_s4 + $0x50] sm:$0xff] }
   0x6   :  { %394 = vmatpush1.msra.mxu0 %v1765_v5  ;;  %1551 = vmatpush3.msk.msra.mxu1 %vm97_vm0, %v214_v6  ;;  %v60_v14 = vld [vmem:[%s2242_s0 + $0x20] sm:$0xff]  ;;  %v208_v16 = vld [vmem:[%s2245_s1 + $0x10] sm:$0xff]  ;;  %v1823_v17 = vld [vmem:[%s2243_s4 + $0x48] sm:$0xff] }
   0x7   :  { %395 = vmatprep.subr.mxu0 %v1775_v7  ;;  %1552 = vmatprep.mubr.msk.f32.mxu1 %vm72_vm1, %v206_v9  ;;  %v1830_v18 = vld [vmem:[%s2243_s4 + $0x40] sm:$0xff]  ;;  %v209_v19 = vld [vmem:[%s2245_s1 + $0x18] sm:$0xff]  ;;  %v61_v20 = vld [vmem:[%s2242_s0 + $0x28] sm:$0xff] }
   0x8   :  { %396 = vmatpush1.msra.mxu0 %v1788_v10  ;;  %1553 = vmatmul.mubr.msk.f32.vlgmr.msra.gmra.mxu1 %vm72_vm1, %v207_v12  ;;  %v1843_v21 = vld [vmem:[%s2243_s4 + $0x38] sm:$0xff]  ;;  %v1849_v22 = vld [vmem:[%s2243_s4 + $0x30] sm:$0xff]  ;;  %v1860_v24 = vld [vmem:[%s2243_s4 + $0x28] sm:$0xff] }
   0x9   :  { %1542 = vmatmul.mubr.msk.f32.gmra.mxu0 %vm72_vm1, %v59_v11  ;;  %397 = vmatprep.subr.mxu0 %v1803_v13  ;;  %v62_v23 = vld [vmem:[%s2242_s0 + $0x30] sm:$0xff]  ;;  %v210_v25 = vld [vmem:[%s2245_s1 + $0x20] sm:$0xff]  ;;  %v211_v27 = vld [vmem:[%s2245_s1 + $0x28] sm:$0xff] }
   0xa   :  { %1544 = vmatprep.mubr.msk.f32.mxu0 %vm72_vm1, %v60_v14  ;;  %398 = vmatpush1.msra.mxu0 %v1813_v15  ;;  %v1870_v26 = vld [vmem:[%s2243_s4 + $0x20] sm:$0xff]  ;;  %v63_v28 = vld [vmem:[%s2242_s0 + $0x38] sm:$0xff]  ;;  %v1890_v30 = vld [vmem:[%s2243_s4 + $0x10] sm:$0xff] }
   0xb   :  { %1555 = vmatprep.mubr.msk.f32.mxu1 %vm72_vm1, %v208_v16  ;;  %399 = vmatprep.subr.mxu0 %v1823_v17  ;;  %v1883_v29 = vld [vmem:[%s2243_s4 + $0x18] sm:$0xff]  ;;  %v212_v31 = vld [vmem:[%s2245_s1 + $0x30] sm:$0xff]  ;;  %v1900_v32 = vld [vmem:[%s2243_s4 + $0x8] sm:$0xff] }
   0xc   :  { %532 = vmatprep.subr.mxu1 %v1760_v4  ;;  %400 = vmatpush1.msra.mxu0 %v1830_v18  ;;  %v1907_v33 = vld [vmem:[%s2243_s4] sm:$0xff]  ;;  %v213_v34 = vld [vmem:[%s2245_s1 + $0x38] sm:$0xff]  ;;  %v1914_v36 = vld [vmem:[#allocation3] sm:$0xff]  ;;  %s1697_s4 = smov 32  }
   0xd   :  { %1556 = vmatmul.mubr.msk.f32.gmra.mxu1 %vm72_vm1, %v209_v19  ;;  %1545 = vmatmul.mubr.msk.f32.gmra.mxu0 %vm72_vm1, %v61_v20  ;;  %v370_v35 = vld [vmem:[#allocation2] sm:$0xff] }
   0xe   :  { %401 = vmatprep.subr.mxu0 %v1843_v21  ;;  %1547 = vmatprep.mubr.msk.f32.mxu0 %vm72_vm1, %v62_v23  ;;  %v1474_v37 = vld [vmem:[%s2246_s5] ss:$0 sm:$0xff]  ;;  %s1698_s5 = smov 64  }
   0xf   :  { %402 = vmatpush1.msra.mxu0 %v1849_v22  ;;  %1558 = vmatprep.mubr.msk.f32.mxu1 %vm72_vm1, %v210_v25  ;;  %v1966_v41 = vld [vmem:[%s2247_s6] ss:$0 sm:$0xff]  ;;  %s1699_s6 = smov 96  }
  0x10   :  { %403 = vmatprep.subr.mxu0 %v1860_v24  ;;  %465 = vrot.lane.b32.xlu1 %v1914_v36, %s1697_s4 }
  0x11   :  { %404 = vmatpush1.msra.mxu0 %v1870_v26  ;;  %1559 = vmatmul.mubr.msk.f32.gmra.mxu1 %vm72_vm1, %v211_v27 }
  0x12   :  { %1548 = vmatmul.mubr.msk.f32.gmra.mxu0 %vm72_vm1, %v63_v28  ;;  %405 = vmatprep.subr.mxu0 %v1883_v29 }
  0x13   :  { %406 = vmatpush1.msra.mxu0 %v1890_v30  ;;  %1561 = vmatprep.mubr.msk.f32.mxu1 %vm72_vm1, %v212_v31 }
  0x14   :  { %407 = vmatprep.subr.mxu0 %v1900_v32  ;;  %441 = vmatprep.mubr.f32.mxu0 %v1696_v3 }
  0x15   :  { %408 = vmatpush1.msra.mxu0 %v1907_v33  ;;  %1562 = vmatmul.mubr.msk.f32.gmra.mxu1 %vm72_vm1, %v213_v34 }
  0x16   :  { %1494 = vmatmul.mubr.msk.f32.vlgmr.msra.gmra.mxu0 %vm52_vm2, %v370_v35  ;;  %533 = vmatpush1.msra.mxu1 %v1765_v5 }
  0x17   :  { %580 = vmatprep.mubr.f32.mxu1 %v1696_v3  ;;  %534 = vmatprep.subr.mxu1 %v1775_v7 }
  0x18   :  { %666 = vmatprep.subr.mxu0 %v1760_v4  ;;  %535 = vmatpush1.msra.mxu1 %v1788_v10 }
  0x19   :  { %667 = vmatpush1.msra.mxu0 %v1765_v5  ;;  %536 = vmatprep.subr.mxu1 %v1803_v13 }
  0x1a   :  { %668 = vmatprep.subr.mxu0 %v1775_v7  ;;  %537 = vmatpush1.msra.mxu1 %v1813_v15 }
  0x1b   :  { %669 = vmatpush1.msra.mxu0 %v1788_v10  ;;  %538 = vmatprep.subr.mxu1 %v1823_v17 }
  0x1c   :  { %670 = vmatprep.subr.mxu0 %v1803_v13  ;;  %539 = vmatpush1.msra.mxu1 %v1830_v18 }
  0x1d   :  { %671 = vmatpush1.msra.mxu0 %v1813_v15  ;;  %540 = vmatprep.subr.mxu1 %v1843_v21 }
  0x1e   :  { %672 = vmatprep.subr.mxu0 %v1823_v17  ;;  %541 = vmatpush1.msra.mxu1 %v1849_v22 }
  0x1f   :  { %673 = vmatpush1.msra.mxu0 %v1830_v18  ;;  %542 = vmatprep.subr.mxu1 %v1860_v24 }
  0x20   :  { %674 = vmatprep.subr.mxu0 %v1843_v21  ;;  %543 = vmatpush1.msra.mxu1 %v1870_v26 }
  0x21   :  { %675 = vmatpush1.msra.mxu0 %v1849_v22  ;;  %544 = vmatprep.subr.mxu1 %v1883_v29 }
  0x22   :  { %676 = vmatprep.subr.mxu0 %v1860_v24  ;;  %545 = vmatpush1.msra.mxu1 %v1890_v30 }
  0x23   :  { %677 = vmatpush1.msra.mxu0 %v1870_v26  ;;  %546 = vmatprep.subr.mxu1 %v1900_v32 }
  0x24   :  { %678 = vmatprep.subr.mxu0 %v1883_v29  ;;  %547 = vmatpush1.msra.mxu1 %v1907_v33 }
  0x25   :  { %679 = vmatpush1.msra.mxu0 %v1890_v30  ;;  %714 = vmatprep.mubr.f32.mxu0 %v1696_v3 }
  0x26   :  { %680 = vmatprep.subr.mxu0 %v1900_v32  ;;  %800 = vmatprep.subr.mxu1 %v1760_v4 }
  0x27   :  { %681 = vmatpush1.msra.mxu0 %v1907_v33 }
  0x28   :  { %934 = vmatprep.subr.mxu0 %v1760_v4 }
  0xc4   :  { %v1540_v38 = vpop.f32.mrf.mxu0 }
  0xc5   :  { %v1961_v39 = vadd.f32 %v1540_v38, %v1474_v37 }
  0xc6   :  { %v167_v40 = vpop.f32.mrf.mxu0 }
  0xc7   :  { %v168_v1 = vadd.f32 %v1474_v37, %v167_v40 }
  0xc8   :  { %v1554_v43 = vpop.f32.mrf.mxu1 }
  0xc9   :  { %v1543_v42 = vpop.f32.mrf.mxu0  ;;  %v1971_v45 = vadd.f32 %v1554_v43, %v1966_v41  ;;  %v466_v43 = vpop.permute.xlu1 %465 }
  0xca   :  { %v1968_v44 = vadd.f32 %v1543_v42, %v1474_v37  ;;  %v315_v47 = vpop.f32.mrf.mxu1 }
  0xcb   :  { %v177_v46 = vpop.f32.mrf.mxu0  ;;  %v1976_v49 = vadd.f32 %v1966_v41, %v315_v47 }
  0xcc   :  { %v1973_v48 = vadd.f32 %v1474_v37, %v177_v46 }
  0xcd   :  { %v1557_v50 = vpop.f32.mrf.mxu1  ;;  %v1546_v51 = vpop.f32.mrf.mxu0 }
  0xce   :  { %v1979_v52 = vadd.f32 %v1557_v50, %v1966_v41  ;;  %v1981_v53 = vadd.f32 %v1546_v51, %v1474_v37 }
  0xcf   :  { %v325_v54 = vpop.f32.mrf.mxu1  ;;  %v187_v55 = vpop.f32.mrf.mxu0 }
  0xd0   :  { %v1984_v56 = vadd.f32 %v1966_v41, %v325_v54  ;;  %v1986_v57 = vadd.f32 %v1474_v37, %v187_v55 }
  0xd1   :  { %v1560_v58 = vpop.f32.mrf.mxu1 }
  0xd2   :  { %v1549_v59 = vpop.f32.mrf.mxu0  ;;  %v1989_v60 = vadd.f32 %v1560_v58, %v1966_v41 }
  0xd3   :  { %v1991_v61 = vadd.f32 %v1549_v59, %v1474_v37  ;;  %v335_v62 = vpop.f32.mrf.mxu1 }
  0xd4   :  { %v197_v63 = vpop.f32.mrf.mxu0  ;;  %v1994_v0 = vadd.f32 %v1966_v41, %v335_v62 }
  0xd5   :  { %v1996_v2 = vadd.f32 %v1474_v37, %v197_v63  ;;  %v1563_v6 = vpop.f32.mrf.mxu1 }
  0xd6   :  { %v351_v8 = vadd.f32 %v1563_v6, %v1966_v41  ;;  %v443_v9 = vpop.f32.mrf.mxu0 }
  0xd7   :  { %v448_v11 = vadd.f32 %v443_v9, %v168_v1 }
  0xd8   :  { %v445_v12 = vpop.f32.mrf.mxu0 }
  0xd9   :  { %1568 = vtanh.f32 %v448_v11  ;;  %v449_v14 = vadd.f32 %v445_v12, %v351_v8  ;;  %v1495_v20 = vmul.f32 -1.442695, %v448_v11  ;;  %v345_v11 = vpop.f32.mrf.mxu1 }
  0xdb   :  { %1570 = vtanh.f32 %v449_v14  ;;  %v1496_v23 = vmul.f32 -1.442695, %v449_v14  ;;  %v346_v14 = vadd.f32 %v1966_v41, %v345_v11 }
  0xdc   :  { %1572 = vpow2.f32 %v1495_v20 }
  0xdd   :  { %1574 = vpow2.f32 %v1496_v23 }
  0xe6   :  { %v1569_v16 = vpop.eup %1568 }
  0xe7   :  { %470 = vrot.lane.b32.xlu0 %v1569_v16, %s1697_s4 }
  0xe8   :  { %v1571_v19 = vpop.eup %1570 }
  0xe9   :  { %v1573_v25 = vpop.eup %1572 }
  0xea   :  { %v453_v27 = vadd.f32 1.0, %v1573_v25  ;;  %v1575_v28 = vpop.eup %1574 }
  0xeb   :  { %481 = vrot.lane.b32.xlu0 %v1571_v19, %s1697_s4  ;;  %v459_v31 = vadd.f32 1.0, %v1575_v28 }
  0xec   :  { %1576 = vrcp.f32 %v453_v27 }
  0xed   :  { %1578 = vrcp.f32 %v459_v31 }
  0xf9   :  { %v1577_v34 = vpop.eup %1576 }
  0xfa   :  { %v1579_v38 = vpop.eup %1578  ;;  %v468_v46 = vmul.f32 %v1577_v34, %v466_v43 }
  0xfb   :  { %v479_v51 = vmul.f32 %v1579_v38, %v1914_v36 }
 0x159   :  { %v471_v35 = vpop.permute.xlu0 %470 }
 0x15a   :  { %v473_v37 = vmul.f32 %v1577_v34, %v471_v35 }
 0x15c   :  { %475 = vrot.lane.b32.xlu1 %v473_v37, %s1697_s4 }
 0x15d   :  { %v482_v40 = vpop.permute.xlu0 %481 }
 0x15e   :  { %v484_v42 = vmul.f32 %v1579_v38, %v482_v40 }
 0x160   :  { %486 = vrot.lane.b32.xlu0 %v484_v42, %s1697_s4 }
 0x1ce   :  { %v476_v47 = vpop.permute.xlu1 %475 }
 0x1cf   :  { %v2003_v50 = vadd.f32 %v476_v47, %v468_v46 }
 0x1d1   :  { %1580 = vtanh.f32 %v2003_v50 }
 0x1d2   :  { %v487_v54 = vpop.permute.xlu0 %486 }
 0x1d3   :  { %v2007_v55 = vadd.f32 %v487_v54, %v479_v51 }
 0x1d5   :  { %1582 = vtanh.f32 %v2007_v55 }
 0x1de   :  { %v1581_v58 = vpop.eup %1580 }
 0x1df   :  { %492 = vrot.lane.b32.xlu1 %v1581_v58, %s1697_s4 }
 0x1e2   :  { %v1583_v59 = vpop.eup %1582 }
 0x1e3   :  { %498 = vrot.lane.b32.xlu0 %v1583_v59, %s1697_s4 }
 0x251   :  { %v493_v62 = vpop.permute.xlu1 %492 }
 0x252   :  { %v495_v63 = vmul.f32 %v1577_v34, %v493_v62 }
 0x254   :  { %503 = vrot.lane.b32.xlu1 %v495_v63, %s1698_s5 }
 0x255   :  { %v499_v1 = vpop.permute.xlu0 %498 }
 0x256   :  { %v501_v6 = vmul.f32 %v1579_v38, %v499_v1 }
 0x258   :  { %507 = vrot.lane.b32.xlu0 %v501_v6, %s1699_s6 }
 0x2c6   :  { %v504_v36 = vpop.permute.xlu1 %503 }
 0x2ca   :  { %v508_v8 = vpop.permute.xlu0 %507 }
 0x2cb   :  { %v2015_v9 = vsel %vm510_vm3, %v504_v36, %v508_v8 }
 0x2cc   :  { %1497 = vmatmul.mubr.msk.f32.vlgmr.msra.gmra.mxu1 %vm52_vm2, %v2015_v9 }
 0x2cd   :  { %801 = vmatpush1.msra.mxu1 %v1765_v5  ;;  %848 = vmatprep.mubr.f32.mxu1 %v1696_v3 }
 0x2ce   :  { %802 = vmatprep.subr.mxu1 %v1775_v7 }
 0x2cf   :  { %803 = vmatpush1.msra.mxu1 %v1788_v10 }
 0x2d0   :  { %804 = vmatprep.subr.mxu1 %v1803_v13 }
 0x2d1   :  { %805 = vmatpush1.msra.mxu1 %v1813_v15 }
 0x2d2   :  { %806 = vmatprep.subr.mxu1 %v1823_v17 }
 0x2d3   :  { %807 = vmatpush1.msra.mxu1 %v1830_v18 }
 0x2d4   :  { %808 = vmatprep.subr.mxu1 %v1843_v21 }
 0x2d5   :  { %809 = vmatpush1.msra.mxu1 %v1849_v22 }
 0x2d6   :  { %810 = vmatprep.subr.mxu1 %v1860_v24 }
 0x2d7   :  { %811 = vmatpush1.msra.mxu1 %v1870_v26 }
 0x2d8   :  { %812 = vmatprep.subr.mxu1 %v1883_v29 }
 0x2d9   :  { %813 = vmatpush1.msra.mxu1 %v1890_v30 }
 0x2da   :  { %814 = vmatprep.subr.mxu1 %v1900_v32 }
 0x2db   :  { %815 = vmatpush1.msra.mxu1 %v1907_v33 }
 0x2dc   :  { %1068 = vmatprep.subr.mxu1 %v1760_v4 }
 0x38c   :  { %v582_v12 = vpop.f32.mrf.mxu1 }
 0x38d   :  { %v587_v16 = vadd.f32 %v582_v12, %v1961_v39 }
 0x38e   :  { %v584_v19 = vpop.f32.mrf.mxu1 }
 0x38f   :  { %1584 = vtanh.f32 %v587_v16  ;;  %v588_v20 = vadd.f32 %v584_v19, %v346_v14  ;;  %v1498_v27 = vmul.f32 -1.442695, %v587_v16 }
 0x391   :  { %1586 = vtanh.f32 %v588_v20  ;;  %v1499_v28 = vmul.f32 -1.442695, %v588_v20 }
 0x392   :  { %1588 = vpow2.f32 %v1498_v27 }
 0x393   :  { %1590 = vpow2.f32 %v1499_v28 }
 0x39c   :  { %v1585_v23 = vpop.eup %1584 }
 0x39d   :  { %605 = vrot.lane.b32.xlu1 %v1585_v23, %s1697_s4 }
 0x39e   :  { %v1587_v25 = vpop.eup %1586 }
 0x39f   :  { %616 = vrot.lane.b32.xlu0 %v1587_v25, %s1697_s4  ;;  %v1589_v31 = vpop.eup %1588 }
 0x3a0   :  { %v1591_v34 = vpop.eup %1590  ;;  %v592_v35 = vadd.f32 1.0, %v1589_v31 }
 0x3a1   :  { %v598_v41 = vadd.f32 1.0, %v1591_v34 }
 0x3a2   :  { %1592 = vrcp.f32 %v592_v35 }
 0x3a3   :  { %1594 = vrcp.f32 %v598_v41 }
 0x3af   :  { %v1593_v39 = vpop.eup %1592 }
 0x3b0   :  { %v1595_v40 = vpop.eup %1594  ;;  %v603_v46 = vmul.f32 %v1593_v39, %v2003_v50 }
 0x3b1   :  { %v614_v54 = vmul.f32 %v1595_v40, %v2007_v55  ;;  %v372_v55 = vld [vmem:[#allocation4] sm:$0xff] }
 0x3b2   :  { %v512_v8 = vadd.f32 %v2015_v9, %v372_v55 }
 0x40f   :  { %v606_v37 = vpop.permute.xlu1 %605 }
 0x410   :  { %v608_v38 = vmul.f32 %v1593_v39, %v606_v37 }
 0x411   :  { %v617_v42 = vpop.permute.xlu0 %616 }
 0x412   :  { %610 = vrot.lane.b32.xlu1 %v608_v38, %s1697_s4  ;;  %v619_v43 = vmul.f32 %v1595_v40, %v617_v42 }
 0x414   :  { %621 = vrot.lane.b32.xlu0 %v619_v43, %s1697_s4 }
 0x484   :  { %v611_v47 = vpop.permute.xlu1 %610 }
 0x485   :  { %v2043_v51 = vadd.f32 %v611_v47, %v603_v46 }
 0x486   :  { %v622_v58 = vpop.permute.xlu0 %621 }
 0x487   :  { %1596 = vtanh.f32 %v2043_v51  ;;  %v2047_v59 = vadd.f32 %v622_v58, %v614_v54 }
 0x489   :  { %1598 = vtanh.f32 %v2047_v59 }
 0x494   :  { %v1597_v62 = vpop.eup %1596 }
 0x495   :  { %627 = vrot.lane.b32.xlu1 %v1597_v62, %s1697_s4 }
 0x496   :  { %v1599_v63 = vpop.eup %1598 }
 0x497   :  { %633 = vrot.lane.b32.xlu0 %v1599_v63, %s1697_s4 }
 0x507   :  { %v628_v1 = vpop.permute.xlu1 %627 }
 0x508   :  { %v630_v50 = vmul.f32 %v1593_v39, %v628_v1 }
 0x509   :  { %v634_v6 = vpop.permute.xlu0 %633 }
 0x50a   :  { %638 = vrot.lane.b32.xlu1 %v630_v50, %s1698_s5  ;;  %v636_v36 = vmul.f32 %v1595_v40, %v634_v6 }
 0x50c   :  { %642 = vrot.lane.b32.xlu0 %v636_v36, %s1699_s6 }
 0x57c   :  { %v639_v11 = vpop.permute.xlu1 %638 }
 0x57e   :  { %v643_v12 = vpop.permute.xlu0 %642 }
 0x57f   :  { %v645_v14 = vsel %vm510_vm3, %v639_v11, %v643_v12 }
 0x580   :  { %v2056_v16 = vadd.f32 %v645_v14, %v512_v8  ;;  %1500 = vmatmul.mubr.msk.f32.vlgmr.msra.gmra.mxu0 %vm52_vm2, %v645_v14 }
 0x581   :  { %935 = vmatpush1.msra.mxu0 %v1765_v5  ;;  %982 = vmatprep.mubr.f32.mxu0 %v1696_v3 }
 0x582   :  { %936 = vmatprep.subr.mxu0 %v1775_v7 }
 0x583   :  { %937 = vmatpush1.msra.mxu0 %v1788_v10 }
 0x584   :  { %938 = vmatprep.subr.mxu0 %v1803_v13 }
 0x585   :  { %939 = vmatpush1.msra.mxu0 %v1813_v15 }
 0x586   :  { %940 = vmatprep.subr.mxu0 %v1823_v17 }
 0x587   :  { %941 = vmatpush1.msra.mxu0 %v1830_v18 }
 0x588   :  { %942 = vmatprep.subr.mxu0 %v1843_v21 }
 0x589   :  { %943 = vmatpush1.msra.mxu0 %v1849_v22 }
 0x58a   :  { %944 = vmatprep.subr.mxu0 %v1860_v24 }
 0x58b   :  { %945 = vmatpush1.msra.mxu0 %v1870_v26 }
 0x58c   :  { %946 = vmatprep.subr.mxu0 %v1883_v29 }
 0x58d   :  { %947 = vmatpush1.msra.mxu0 %v1890_v30 }
 0x58e   :  { %948 = vmatprep.subr.mxu0 %v1900_v32 }
 0x58f   :  { %949 = vmatpush1.msra.mxu0 %v1907_v33 }
 0x590   :  { %1202 = vmatprep.subr.mxu0 %v1760_v4 }
 0x640   :  { %v716_v9 = vpop.f32.mrf.mxu0 }
 0x641   :  { %v721_v19 = vadd.f32 %v716_v9, %v1973_v48 }
 0x642   :  { %v718_v20 = vpop.f32.mrf.mxu0 }
 0x643   :  { %1600 = vtanh.f32 %v721_v19  ;;  %v722_v23 = vadd.f32 %v718_v20, %v1989_v60  ;;  %v1501_v28 = vmul.f32 -1.442695, %v721_v19 }
 0x645   :  { %1602 = vtanh.f32 %v722_v23  ;;  %v1502_v31 = vmul.f32 -1.442695, %v722_v23 }
 0x646   :  { %1604 = vpow2.f32 %v1501_v28 }
 0x647   :  { %1606 = vpow2.f32 %v1502_v31 }
 0x650   :  { %v1601_v25 = vpop.eup %1600 }
 0x651   :  { %739 = vrot.lane.b32.xlu1 %v1601_v25, %s1697_s4 }
 0x652   :  { %v1603_v27 = vpop.eup %1602 }
 0x653   :  { %750 = vrot.lane.b32.xlu0 %v1603_v27, %s1697_s4  ;;  %v1605_v34 = vpop.eup %1604 }
 0x654   :  { %v1607_v35 = vpop.eup %1606  ;;  %v726_v41 = vadd.f32 1.0, %v1605_v34 }
 0x655   :  { %v732_v39 = vadd.f32 1.0, %v1607_v35 }
 0x656   :  { %1608 = vrcp.f32 %v726_v41 }
 0x657   :  { %1610 = vrcp.f32 %v732_v39 }
 0x663   :  { %v1609_v48 = vpop.eup %1608 }
 0x664   :  { %v1611_v38 = vpop.eup %1610  ;;  %v737_v43 = vmul.f32 %v1609_v48, %v2043_v51 }
 0x665   :  { %v748_v54 = vmul.f32 %v1611_v38, %v2047_v59 }
 0x6c3   :  { %v740_v37 = vpop.permute.xlu1 %739 }
 0x6c4   :  { %v742_v60 = vmul.f32 %v1609_v48, %v740_v37 }
 0x6c5   :  { %v751_v40 = vpop.permute.xlu0 %750 }
 0x6c6   :  { %744 = vrot.lane.b32.xlu1 %v742_v60, %s1697_s4  ;;  %v753_v42 = vmul.f32 %v1611_v38, %v751_v40 }
 0x6c8   :  { %755 = vrot.lane.b32.xlu0 %v753_v42, %s1697_s4 }
 0x738   :  { %v745_v46 = vpop.permute.xlu1 %744 }
 0x739   :  { %v2083_v47 = vadd.f32 %v745_v46, %v737_v43 }
 0x73a   :  { %v756_v58 = vpop.permute.xlu0 %755 }
 0x73b   :  { %1612 = vtanh.f32 %v2083_v47  ;;  %v2087_v62 = vadd.f32 %v756_v58, %v748_v54 }
 0x73d   :  { %1614 = vtanh.f32 %v2087_v62 }
 0x748   :  { %v1613_v63 = vpop.eup %1612 }
 0x749   :  { %761 = vrot.lane.b32.xlu1 %v1613_v63, %s1697_s4 }
 0x74a   :  { %v1615_v1 = vpop.eup %1614 }
 0x74b   :  { %767 = vrot.lane.b32.xlu0 %v1615_v1, %s1697_s4 }
 0x7bb   :  { %v762_v50 = vpop.permute.xlu1 %761 }
 0x7bc   :  { %v764_v51 = vmul.f32 %v1609_v48, %v762_v50 }
 0x7bd   :  { %v768_v6 = vpop.permute.xlu0 %767 }
 0x7be   :  { %772 = vrot.lane.b32.xlu1 %v764_v51, %s1698_s5  ;;  %v770_v36 = vmul.f32 %v1611_v38, %v768_v6 }
 0x7c0   :  { %776 = vrot.lane.b32.xlu0 %v770_v36, %s1699_s6 }
 0x830   :  { %v773_v59 = vpop.permute.xlu1 %772 }
 0x832   :  { %v777_v55 = vpop.permute.xlu0 %776 }
 0x833   :  { %v779_v8 = vsel %vm510_vm3, %v773_v59, %v777_v55 }
 0x834   :  { %v2096_v11 = vadd.f32 %v779_v8, %v2056_v16  ;;  %1503 = vmatmul.mubr.msk.f32.vlgmr.msra.gmra.mxu1 %vm52_vm2, %v779_v8 }
 0x835   :  { %1069 = vmatpush1.msra.mxu1 %v1765_v5  ;;  %1116 = vmatprep.mubr.f32.mxu1 %v1696_v3 }
 0x836   :  { %1070 = vmatprep.subr.mxu1 %v1775_v7 }
 0x837   :  { %1071 = vmatpush1.msra.mxu1 %v1788_v10 }
 0x838   :  { %1072 = vmatprep.subr.mxu1 %v1803_v13 }
 0x839   :  { %1073 = vmatpush1.msra.mxu1 %v1813_v15 }
 0x83a   :  { %1074 = vmatprep.subr.mxu1 %v1823_v17 }
 0x83b   :  { %1075 = vmatpush1.msra.mxu1 %v1830_v18 }
 0x83c   :  { %1076 = vmatprep.subr.mxu1 %v1843_v21 }
 0x83d   :  { %1077 = vmatpush1.msra.mxu1 %v1849_v22 }
 0x83e   :  { %1078 = vmatprep.subr.mxu1 %v1860_v24 }
 0x83f   :  { %1079 = vmatpush1.msra.mxu1 %v1870_v26 }
 0x840   :  { %1080 = vmatprep.subr.mxu1 %v1883_v29 }
 0x841   :  { %1081 = vmatpush1.msra.mxu1 %v1890_v30 }
 0x842   :  { %1082 = vmatprep.subr.mxu1 %v1900_v32 }
 0x843   :  { %1083 = vmatpush1.msra.mxu1 %v1907_v33 }
 0x844   :  { %1336 = vmatprep.subr.mxu1 %v1760_v4 }
 0x8f4   :  { %v850_v12 = vpop.f32.mrf.mxu1 }
 0x8f5   :  { %v855_v14 = vadd.f32 %v850_v12, %v1968_v44 }
 0x8f6   :  { %v852_v16 = vpop.f32.mrf.mxu1 }
 0x8f7   :  { %1616 = vtanh.f32 %v855_v14  ;;  %v856_v9 = vadd.f32 %v852_v16, %v1994_v0  ;;  %v1504_v23 = vmul.f32 -1.442695, %v855_v14 }
 0x8f9   :  { %1618 = vtanh.f32 %v856_v9  ;;  %v1505_v25 = vmul.f32 -1.442695, %v856_v9 }
 0x8fa   :  { %1620 = vpow2.f32 %v1504_v23 }
 0x8fb   :  { %1622 = vpow2.f32 %v1505_v25 }
 0x904   :  { %v1617_v19 = vpop.eup %1616 }
 0x905   :  { %873 = vrot.lane.b32.xlu1 %v1617_v19, %s1697_s4 }
 0x906   :  { %v1619_v20 = vpop.eup %1618 }
 0x907   :  { %884 = vrot.lane.b32.xlu0 %v1619_v20, %s1697_s4  ;;  %v1621_v27 = vpop.eup %1620 }
 0x908   :  { %v1623_v4 = vpop.eup %1622  ;;  %v860_v28 = vadd.f32 1.0, %v1621_v27 }
 0x909   :  { %v866_v31 = vadd.f32 1.0, %v1623_v4 }
 0x90a   :  { %1624 = vrcp.f32 %v860_v28 }
 0x90b   :  { %1626 = vrcp.f32 %v866_v31 }
 0x917   :  { %v1625_v44 = vpop.eup %1624 }
 0x918   :  { %v1627_v35 = vpop.eup %1626  ;;  %v871_v48 = vmul.f32 %v1625_v44, %v2083_v47 }
 0x919   :  { %v882_v38 = vmul.f32 %v1627_v35, %v2087_v62 }
 0x977   :  { %v874_v34 = vpop.permute.xlu1 %873 }
 0x978   :  { %v876_v0 = vmul.f32 %v1625_v44, %v874_v34 }
 0x979   :  { %v885_v41 = vpop.permute.xlu0 %884 }
 0x97a   :  { %878 = vrot.lane.b32.xlu1 %v876_v0, %s1697_s4  ;;  %v887_v39 = vmul.f32 %v1627_v35, %v885_v41 }
 0x97c   :  { %889 = vrot.lane.b32.xlu0 %v887_v39, %s1697_s4 }
 0x9ec   :  { %v879_v37 = vpop.permute.xlu1 %878 }
 0x9ed   :  { %v2123_v60 = vadd.f32 %v879_v37, %v871_v48 }
 0x9ee   :  { %v890_v40 = vpop.permute.xlu0 %889 }
 0x9ef   :  { %1628 = vtanh.f32 %v2123_v60  ;;  %v2127_v42 = vadd.f32 %v890_v40, %v882_v38 }
 0x9f1   :  { %1630 = vtanh.f32 %v2127_v42 }
 0x9fc   :  { %v1629_v43 = vpop.eup %1628 }
 0x9fd   :  { %895 = vrot.lane.b32.xlu1 %v1629_v43, %s1697_s4 }
 0x9fe   :  { %v1631_v46 = vpop.eup %1630 }
 0x9ff   :  { %901 = vrot.lane.b32.xlu0 %v1631_v46, %s1697_s4 }
 0xa6f   :  { %v896_v54 = vpop.permute.xlu1 %895 }
 0xa70   :  { %v898_v47 = vmul.f32 %v1625_v44, %v896_v54 }
 0xa71   :  { %v902_v58 = vpop.permute.xlu0 %901 }
 0xa72   :  { %906 = vrot.lane.b32.xlu1 %v898_v47, %s1698_s5  ;;  %v904_v63 = vmul.f32 %v1627_v35, %v902_v58 }
 0xa74   :  { %910 = vrot.lane.b32.xlu0 %v904_v63, %s1699_s6 }
 0xae4   :  { %v907_v62 = vpop.permute.xlu1 %906 }
 0xae6   :  { %v911_v1 = vpop.permute.xlu0 %910 }
 0xae7   :  { %v913_v50 = vsel %vm510_vm3, %v907_v62, %v911_v1 }
 0xae8   :  { %v2136_v51 = vadd.f32 %v913_v50, %v2096_v11  ;;  %1506 = vmatmul.mubr.msk.f32.vlgmr.msra.gmra.mxu0 %vm52_vm2, %v913_v50 }
 0xae9   :  { %1203 = vmatpush1.msra.mxu0 %v1765_v5  ;;  %1250 = vmatprep.mubr.f32.mxu0 %v1696_v3 }
 0xaea   :  { %1204 = vmatprep.subr.mxu0 %v1775_v7 }
 0xaeb   :  { %1205 = vmatpush1.msra.mxu0 %v1788_v10 }
 0xaec   :  { %1206 = vmatprep.subr.mxu0 %v1803_v13 }
 0xaed   :  { %1207 = vmatpush1.msra.mxu0 %v1813_v15 }
 0xaee   :  { %1208 = vmatprep.subr.mxu0 %v1823_v17 }
 0xaef   :  { %1209 = vmatpush1.msra.mxu0 %v1830_v18 }
 0xaf0   :  { %1210 = vmatprep.subr.mxu0 %v1843_v21 }
 0xaf1   :  { %1211 = vmatpush1.msra.mxu0 %v1849_v22 }
 0xaf2   :  { %1212 = vmatprep.subr.mxu0 %v1860_v24 }
 0xaf3   :  { %1213 = vmatpush1.msra.mxu0 %v1870_v26 }
 0xaf4   :  { %1214 = vmatprep.subr.mxu0 %v1883_v29 }
 0xaf5   :  { %1215 = vmatpush1.msra.mxu0 %v1890_v30 }
 0xaf6   :  { %1216 = vmatprep.subr.mxu0 %v1900_v32 }
 0xaf7   :  { %1217 = vmatpush1.msra.mxu0 %v1907_v33 }
 0xba8   :  { %v984_v6 = vpop.f32.mrf.mxu0 }
 0xba9   :  { %v989_v36 = vadd.f32 %v984_v6, %v1986_v57 }
 0xbaa   :  { %v986_v59 = vpop.f32.mrf.mxu0 }
 0xbab   :  { %1632 = vtanh.f32 %v989_v36  ;;  %v990_v55 = vadd.f32 %v986_v59, %v1979_v52  ;;  %v1507_v12 = vmul.f32 -1.442695, %v989_v36 }
 0xbad   :  { %1634 = vtanh.f32 %v990_v55  ;;  %v1508_v14 = vmul.f32 -1.442695, %v990_v55 }
 0xbae   :  { %1636 = vpow2.f32 %v1507_v12 }
 0xbaf   :  { %1638 = vpow2.f32 %v1508_v14 }
 0xbb8   :  { %v1633_v8 = vpop.eup %1632 }
 0xbb9   :  { %1007 = vrot.lane.b32.xlu1 %v1633_v8, %s1697_s4 }
 0xbba   :  { %v1635_v11 = vpop.eup %1634 }
 0xbbb   :  { %1018 = vrot.lane.b32.xlu0 %v1635_v11, %s1697_s4  ;;  %v1637_v16 = vpop.eup %1636 }
 0xbbc   :  { %v1639_v9 = vpop.eup %1638  ;;  %v994_v19 = vadd.f32 1.0, %v1637_v16 }
 0xbbd   :  { %v1000_v20 = vadd.f32 1.0, %v1639_v9 }
 0xbbe   :  { %1640 = vrcp.f32 %v994_v19 }
 0xbbf   :  { %1642 = vrcp.f32 %v1000_v20 }
 0xbcb   :  { %v1641_v57 = vpop.eup %1640 }
 0xbcc   :  { %v1643_v25 = vpop.eup %1642  ;;  %v1005_v28 = vmul.f32 %v1641_v57, %v2123_v60 }
 0xbcd   :  { %v1016_v34 = vmul.f32 %v1643_v25, %v2127_v42 }
 0xc2b   :  { %v1008_v23 = vpop.permute.xlu1 %1007 }
 0xc2c   :  { %v1010_v52 = vmul.f32 %v1641_v57, %v1008_v23 }
 0xc2d   :  { %v1019_v27 = vpop.permute.xlu0 %1018 }
 0xc2e   :  { %1012 = vrot.lane.b32.xlu1 %v1010_v52, %s1697_s4  ;;  %v1021_v4 = vmul.f32 %v1643_v25, %v1019_v27 }
 0xc30   :  { %1023 = vrot.lane.b32.xlu0 %v1021_v4, %s1697_s4 }
 0xca0   :  { %v1013_v31 = vpop.permute.xlu1 %1012 }
 0xca1   :  { %v2162_v44 = vadd.f32 %v1013_v31, %v1005_v28 }
 0xca2   :  { %v1024_v0 = vpop.permute.xlu0 %1023 }
 0xca3   :  { %1644 = vtanh.f32 %v2162_v44  ;;  %v2166_v35 = vadd.f32 %v1024_v0, %v1016_v34 }
 0xca5   :  { %1646 = vtanh.f32 %v2166_v35 }
 0xcb0   :  { %v1645_v41 = vpop.eup %1644 }
 0xcb1   :  { %1029 = vrot.lane.b32.xlu1 %v1645_v41, %s1697_s4 }
 0xcb2   :  { %v1647_v39 = vpop.eup %1646 }
 0xcb3   :  { %1035 = vrot.lane.b32.xlu0 %v1647_v39, %s1697_s4 }
 0xd23   :  { %v1030_v48 = vpop.permute.xlu1 %1029 }
 0xd24   :  { %v1032_v37 = vmul.f32 %v1641_v57, %v1030_v48 }
 0xd25   :  { %v1036_v60 = vpop.permute.xlu0 %1035 }
 0xd26   :  { %1040 = vrot.lane.b32.xlu1 %v1032_v37, %s1698_s5  ;;  %v1038_v38 = vmul.f32 %v1643_v25, %v1036_v60 }
 0xd28   :  { %1044 = vrot.lane.b32.xlu0 %v1038_v38, %s1699_s6 }
 0xd98   :  { %v1041_v40 = vpop.permute.xlu1 %1040 }
 0xd9a   :  { %v1045_v42 = vpop.permute.xlu0 %1044 }
 0xd9b   :  { %v1047_v43 = vsel %vm510_vm3, %v1041_v40, %v1045_v42 }
 0xd9c   :  { %v2175_v46 = vadd.f32 %v1047_v43, %v2136_v51  ;;  %1509 = vmatmul.mubr.msk.f32.vlgmr.msra.gmra.mxu1 %vm52_vm2, %v1047_v43 }
 0xd9d   :  { %1337 = vmatpush1.msra.mxu1 %v1765_v5  ;;  %1384 = vmatprep.mubr.f32.mxu1 %v1696_v3 }
 0xd9e   :  { %1338 = vmatprep.subr.mxu1 %v1775_v7 }
 0xd9f   :  { %1339 = vmatpush1.msra.mxu1 %v1788_v10 }
 0xda0   :  { %1340 = vmatprep.subr.mxu1 %v1803_v13 }
 0xda1   :  { %1341 = vmatpush1.msra.mxu1 %v1813_v15 }
 0xda2   :  { %1342 = vmatprep.subr.mxu1 %v1823_v17 }
 0xda3   :  { %1343 = vmatpush1.msra.mxu1 %v1830_v18 }
 0xda4   :  { %1344 = vmatprep.subr.mxu1 %v1843_v21 }
 0xda5   :  { %1345 = vmatpush1.msra.mxu1 %v1849_v22 }
 0xda6   :  { %1346 = vmatprep.subr.mxu1 %v1860_v24 }
 0xda7   :  { %1347 = vmatpush1.msra.mxu1 %v1870_v26 }
 0xda8   :  { %1348 = vmatprep.subr.mxu1 %v1883_v29 }
 0xda9   :  { %1349 = vmatpush1.msra.mxu1 %v1890_v30 }
 0xdaa   :  { %1350 = vmatprep.subr.mxu1 %v1900_v32 }
 0xdab   :  { %1351 = vmatpush1.msra.mxu1 %v1907_v33 }
 0xe5c   :  { %v1118_v3 = vpop.f32.mrf.mxu1 }
 0xe5d   :  { %v1123_v5 = vadd.f32 %v1118_v3, %v1981_v53 }
 0xe5e   :  { %v1120_v7 = vpop.f32.mrf.mxu1 }
 0xe5f   :  { %1648 = vtanh.f32 %v1123_v5  ;;  %v1124_v10 = vadd.f32 %v1120_v7, %v1984_v56  ;;  %v1510_v17 = vmul.f32 -1.442695, %v1123_v5 }
 0xe61   :  { %1650 = vtanh.f32 %v1124_v10  ;;  %v1511_v18 = vmul.f32 -1.442695, %v1124_v10 }
 0xe62   :  { %1652 = vpow2.f32 %v1510_v17 }
 0xe63   :  { %1654 = vpow2.f32 %v1511_v18 }
 0xe6c   :  { %v1649_v13 = vpop.eup %1648 }
 0xe6d   :  { %1141 = vrot.lane.b32.xlu1 %v1649_v13, %s1697_s4 }
 0xe6e   :  { %v1651_v15 = vpop.eup %1650 }
 0xe6f   :  { %1152 = vrot.lane.b32.xlu0 %v1651_v15, %s1697_s4  ;;  %v1653_v21 = vpop.eup %1652 }
 0xe70   :  { %v1655_v22 = vpop.eup %1654  ;;  %v1128_v24 = vadd.f32 1.0, %v1653_v21 }
 0xe71   :  { %v1134_v26 = vadd.f32 1.0, %v1655_v22 }
 0xe72   :  { %1656 = vrcp.f32 %v1128_v24 }
 0xe73   :  { %1658 = vrcp.f32 %v1134_v26 }
 0xe7f   :  { %v1657_v29 = vpop.eup %1656 }
 0xe80   :  { %v1659_v33 = vpop.eup %1658  ;;  %v1139_v54 = vmul.f32 %v1657_v29, %v2162_v44 }
 0xe81   :  { %v1150_v63 = vmul.f32 %v1659_v33, %v2166_v35 }
 0xedf   :  { %v1142_v30 = vpop.permute.xlu1 %1141 }
 0xee0   :  { %v1144_v32 = vmul.f32 %v1657_v29, %v1142_v30 }
 0xee1   :  { %v1153_v53 = vpop.permute.xlu0 %1152 }
 0xee2   :  { %1146 = vrot.lane.b32.xlu1 %v1144_v32, %s1697_s4  ;;  %v1155_v56 = vmul.f32 %v1659_v33, %v1153_v53 }
 0xee4   :  { %1157 = vrot.lane.b32.xlu0 %v1155_v56, %s1697_s4 }
 0xf54   :  { %v1147_v47 = vpop.permute.xlu1 %1146 }
 0xf55   :  { %v1149_v58 = vadd.f32 %v1147_v47, %v1139_v54 }
 0xf56   :  { %v1158_v62 = vpop.permute.xlu0 %1157 }
 0xf57   :  { %1660 = vtanh.f32 %v1149_v58  ;;  %v1160_v1 = vadd.f32 %v1158_v62, %v1150_v63 }
 0xf59   :  { %1662 = vtanh.f32 %v1160_v1 }
 0xf64   :  { %v1661_v50 = vpop.eup %1660 }
 0xf65   :  { %1163 = vrot.lane.b32.xlu1 %v1661_v50, %s1697_s4 }
 0xf66   :  { %v1663_v51 = vpop.eup %1662 }
 0xf67   :  { %1169 = vrot.lane.b32.xlu0 %v1663_v51, %s1697_s4 }
 0xfd7   :  { %v1164_v6 = vpop.permute.xlu1 %1163 }
 0xfd8   :  { %v1166_v36 = vmul.f32 %v1657_v29, %v1164_v6 }
 0xfd9   :  { %v1170_v59 = vpop.permute.xlu0 %1169 }
 0xfda   :  { %1174 = vrot.lane.b32.xlu1 %v1166_v36, %s1698_s5  ;;  %v1172_v55 = vmul.f32 %v1659_v33, %v1170_v59 }
 0xfdc   :  { %1178 = vrot.lane.b32.xlu0 %v1172_v55, %s1699_s6 }
0x104c   :  { %v1175_v8 = vpop.permute.xlu1 %1174 }
0x104e   :  { %v1179_v11 = vpop.permute.xlu0 %1178 }
0x104f   :  { %v1181_v12 = vsel %vm510_vm3, %v1175_v8, %v1179_v11 }
0x1050   :  { %v1182_v14 = vadd.f32 %v1181_v12, %v2175_v46  ;;  %1512 = vmatmul.mubr.msk.f32.vlgmr.msra.gmra.mxu0 %vm52_vm2, %v1181_v12 }
0x1110   :  { %v1252_v16 = vpop.f32.mrf.mxu0 }
0x1111   :  { %v1257_v9 = vadd.f32 %v1252_v16, %v1996_v2 }
0x1112   :  { %v1254_v19 = vpop.f32.mrf.mxu0 }
0x1113   :  { %1664 = vtanh.f32 %v1257_v9  ;;  %v1258_v20 = vadd.f32 %v1254_v19, %v1971_v45  ;;  %v1513_v52 = vmul.f32 -1.442695, %v1257_v9 }
0x1115   :  { %1666 = vtanh.f32 %v1258_v20  ;;  %v1514_v25 = vmul.f32 -1.442695, %v1258_v20 }
0x1116   :  { %1668 = vpow2.f32 %v1513_v52 }
0x1117   :  { %1670 = vpow2.f32 %v1514_v25 }
0x1120   :  { %v1665_v57 = vpop.eup %1664 }
0x1121   :  { %1275 = vrot.lane.b32.xlu1 %v1665_v57, %s1697_s4 }
0x1122   :  { %v1667_v23 = vpop.eup %1666 }
0x1123   :  { %1286 = vrot.lane.b32.xlu0 %v1667_v23, %s1697_s4  ;;  %v1669_v27 = vpop.eup %1668 }
0x1124   :  { %v1671_v4 = vpop.eup %1670  ;;  %v1262_v28 = vadd.f32 1.0, %v1669_v27 }
0x1125   :  { %v1268_v31 = vadd.f32 1.0, %v1671_v4 }
0x1126   :  { %1672 = vrcp.f32 %v1262_v28 }
0x1127   :  { %1674 = vrcp.f32 %v1268_v31 }
0x1133   :  { %v1673_v2 = vpop.eup %1672 }
0x1134   :  { %v1675_v34 = vpop.eup %1674  ;;  %v1273_v41 = vmul.f32 %v1673_v2, %v1149_v58 }
0x1135   :  { %v1284_v37 = vmul.f32 %v1675_v34, %v1160_v1 }
0x1193   :  { %v1276_v44 = vpop.permute.xlu1 %1275 }
0x1194   :  { %v1278_v45 = vmul.f32 %v1673_v2, %v1276_v44 }
0x1195   :  { %v1287_v0 = vpop.permute.xlu0 %1286 }
0x1196   :  { %1280 = vrot.lane.b32.xlu1 %v1278_v45, %s1697_s4  ;;  %v1289_v35 = vmul.f32 %v1675_v34, %v1287_v0 }
0x1198   :  { %1291 = vrot.lane.b32.xlu0 %v1289_v35, %s1697_s4 }
0x1208   :  { %v1281_v39 = vpop.permute.xlu1 %1280 }
0x1209   :  { %v1283_v48 = vadd.f32 %v1281_v39, %v1273_v41 }
0x120a   :  { %v1292_v60 = vpop.permute.xlu0 %1291 }
0x120b   :  { %1676 = vtanh.f32 %v1283_v48  ;;  %v1294_v38 = vadd.f32 %v1292_v60, %v1284_v37 }
0x120d   :  { %1678 = vtanh.f32 %v1294_v38 }
0x1218   :  { %v1677_v40 = vpop.eup %1676 }
0x1219   :  { %1297 = vrot.lane.b32.xlu1 %v1677_v40, %s1697_s4 }
0x121a   :  { %v1679_v42 = vpop.eup %1678 }
0x121b   :  { %1303 = vrot.lane.b32.xlu0 %v1679_v42, %s1697_s4 }
0x128b   :  { %v1298_v43 = vpop.permute.xlu1 %1297 }
0x128c   :  { %v1300_v46 = vmul.f32 %v1673_v2, %v1298_v43 }
0x128d   :  { %v1304_v3 = vpop.permute.xlu0 %1303 }
0x128e   :  { %1308 = vrot.lane.b32.xlu1 %v1300_v46, %s1698_s5  ;;  %v1306_v5 = vmul.f32 %v1675_v34, %v1304_v3 }
0x1290   :  { %1312 = vrot.lane.b32.xlu0 %v1306_v5, %s1699_s6 }
0x1300   :  { %v1309_v7 = vpop.permute.xlu1 %1308 }
0x1302   :  { %v1313_v10 = vpop.permute.xlu0 %1312 }
0x1303   :  { %v1315_v13 = vsel %vm510_vm3, %v1309_v7, %v1313_v10 }
0x1304   :  { %v1316_v15 = vadd.f32 %v1315_v13, %v1182_v14  ;;  %1515 = vmatmul.mubr.msk.f32.vlgmr.msra.gmra.mxu1 %vm52_vm2, %v1315_v13 }
0x13c4   :  { %v1386_v17 = vpop.f32.mrf.mxu1 }
0x13c5   :  { %v1391_v18 = vadd.f32 %v1386_v17, %v1991_v61 }
0x13c6   :  { %v1388_v21 = vpop.f32.mrf.mxu1 }
0x13c7   :  { %1680 = vtanh.f32 %v1391_v18  ;;  %v1392_v22 = vadd.f32 %v1388_v21, %v1976_v49  ;;  %v1516_v29 = vmul.f32 -1.442695, %v1391_v18 }
0x13c9   :  { %1682 = vtanh.f32 %v1392_v22  ;;  %v1517_v30 = vmul.f32 -1.442695, %v1392_v22 }
0x13ca   :  { %1684 = vpow2.f32 %v1516_v29 }
0x13cb   :  { %1686 = vpow2.f32 %v1517_v30 }
0x13d4   :  { %v1681_v24 = vpop.eup %1680 }
0x13d5   :  { %1409 = vrot.lane.b32.xlu1 %v1681_v24, %s1697_s4 }
0x13d6   :  { %v1683_v26 = vpop.eup %1682 }
0x13d7   :  { %1420 = vrot.lane.b32.xlu0 %v1683_v26, %s1697_s4  ;;  %v1685_v32 = vpop.eup %1684 }
0x13d8   :  { %v1687_v33 = vpop.eup %1686  ;;  %v1396_v53 = vadd.f32 1.0, %v1685_v32 }
0x13d9   :  { %v1402_v56 = vadd.f32 1.0, %v1687_v33 }
0x13da   :  { %1688 = vrcp.f32 %v1396_v53 }
0x13db   :  { %1690 = vrcp.f32 %v1402_v56 }
0x13e7   :  { %v1689_v61 = vpop.eup %1688 }
0x13e8   :  { %v1691_v47 = vpop.eup %1690  ;;  %v1407_v62 = vmul.f32 %v1689_v61, %v1283_v48 }
0x13e9   :  { %v1418_v51 = vmul.f32 %v1691_v47, %v1294_v38 }
0x1447   :  { %v1410_v54 = vpop.permute.xlu1 %1409 }
0x1448   :  { %v1412_v49 = vmul.f32 %v1689_v61, %v1410_v54 }
0x1449   :  { %v1421_v58 = vpop.permute.xlu0 %1420 }
0x144a   :  { %1414 = vrot.lane.b32.xlu1 %v1412_v49, %s1697_s4  ;;  %v1423_v63 = vmul.f32 %v1691_v47, %v1421_v58 }
0x144c   :  { %1425 = vrot.lane.b32.xlu0 %v1423_v63, %s1697_s4 }
0x14bc   :  { %v1415_v1 = vpop.permute.xlu1 %1414 }
0x14bd   :  { %v1417_v50 = vadd.f32 %v1415_v1, %v1407_v62 }
0x14be   :  { %v1426_v6 = vpop.permute.xlu0 %1425 }
0x14bf   :  { %1692 = vtanh.f32 %v1417_v50  ;;  %v1428_v36 = vadd.f32 %v1426_v6, %v1418_v51 }
0x14c1   :  { %1694 = vtanh.f32 %v1428_v36 }
0x14cc   :  { %v1693_v59 = vpop.eup %1692 }
0x14cd   :  { %1431 = vrot.lane.b32.xlu1 %v1693_v59, %s1697_s4 }
0x14ce   :  { %v1695_v55 = vpop.eup %1694 }
0x14cf   :  { %1437 = vrot.lane.b32.xlu0 %v1695_v55, %s1697_s4 }
0x153f   :  { %v1432_v8 = vpop.permute.xlu1 %1431 }
0x1540   :  { %v1434_v11 = vmul.f32 %v1689_v61, %v1432_v8 }
0x1541   :  { %v1438_v12 = vpop.permute.xlu0 %1437 }
0x1542   :  { %1442 = vrot.lane.b32.xlu1 %v1434_v11, %s1698_s5  ;;  %v1440_v14 = vmul.f32 %v1691_v47, %v1438_v12 }
0x1544   :  { %1446 = vrot.lane.b32.xlu0 %v1440_v14, %s1699_s6 }
0x1546   :  { %1453 = vrot.lane.b32.xlu1 %v1417_v50, %s1699_s6 }
0x15b4   :  { %v1443_v16 = vpop.permute.xlu1 %1442 }
0x15b6   :  { %v1447_v9 = vpop.permute.xlu0 %1446 }
0x15b7   :  { %v1449_v19 = vsel %vm510_vm3, %v1443_v16, %v1447_v9 }
0x15b8   :  { %v1454_v20 = vpop.permute.xlu1 %1453  ;;  %v1450_v57 = vadd.f32 %v1449_v19, %v1316_v15  ;;  %1451 = vst.msk [vmem:[#allocation2] sm:$0xff] %vm52_vm2, %v1449_v19 }
0x15b9   :  { %v1456_v23 = vsel %vm510_vm3, %v1454_v20, %v1428_v36 }
0x15ba   :  { %1457 = vst.msk [vmem:[#allocation3] sm:$0xff] %vm52_vm2, %v1456_v23  ;;  %1458 = vst.msk [vmem:[#allocation4] sm:$0xff] %vm52_vm2, %v1450_v57  ;;  %v1462_v52 = vmul.f32 0.125, %v1450_v57 }
0x15bc   :  { %1463 = vst.msk [vmem:[%s2248_s7] sm:$0xff] %vm52_vm2, %v1462_v52 }

</bundles_post_ra>
